<compile_context>
chip_gen: v5e
topology: v5e:2x2
jax: 0.10.0
libtpu: 0.0.40
codegen_flags: <defaults>
</compile_context>

<pallas_src>
import functools
import math

import jax
import jax.numpy as jnp
from jax.experimental import pallas as pl
from jax.experimental.pallas import tpu as pltpu

LN_EPS = 1e-12                      # ESM1bLayerNorm default eps
COMPUTE_DTYPE = jnp.bfloat16        # MXU-native operand dtype; accumulation in f32
GEMM_VMEM_LIMIT = 32 * 1024 * 1024  # safe on v5e (128 MiB phys) and v7x (64 MiB phys)


# ----------------------------------------------------------------------------
# helpers
# ----------------------------------------------------------------------------
def _round_up(x, m):
    return (x + m - 1) // m * m


def _choose_divisor_tile(dim, target, align):
    """Largest tile <= target that divides `dim` and is a multiple of `align`.

    Used for weight / model dims (D, 3D, F, padded vocab, S) which are nicely
    divisible; small dims fall back to the full dim (always a legal block)."""
    if dim <= target:
        return dim
    t = (target // align) * align
    while t >= align:
        if dim % t == 0:
            return t
        t -= align
    return dim


def _m_tile_and_pad(M, target=512, align=16):
    """Row-tile (B*S axis) and padded extent.

    Never falls back to a full-dim block for large M: rows are padded to a tile
    multiple instead (output sliced back), so VMEM stays bounded even when B*S
    has no aligned divisor. 16-alignment keeps bf16 sublane packing unmasked."""
    if M <= target:
        tm = _round_up(M, align)
        return tm, tm
    return target, _round_up(M, target)


def _pad_rows(x2d, m_padded):
    m = x2d.shape[0]
    if m_padded == m:
        return x2d
    return jnp.pad(x2d, ((0, m_padded - m), (0, 0)))


def _gelu(x):
    # ESM exact gelu: x * 0.5 * (1 + erf(x / sqrt(2)))
    return x * 0.5 * (1.0 + jax.lax.erf(x / math.sqrt(2.0)))


# ----------------------------------------------------------------------------
# Pallas kernels
# ----------------------------------------------------------------------------
def _matmul_kernel(*refs, activation, has_residual):
    """o = [residual +] act(x @ w + b); K-tiled with an f32 accumulator scratch."""
    if has_residual:
        x_ref, w_ref, b_ref, res_ref, o_ref, acc_ref = refs
    else:
        x_ref, w_ref, b_ref, o_ref, acc_ref = refs
        res_ref = None
    k = pl.program_id(2)

    @pl.when(k == 0)
    def _():
        acc_ref[...] = jnp.zeros_like(acc_ref)

    # w is pre-transposed to (K, N): contract directly on K, no in-kernel transpose.
    acc_ref[...] += jnp.dot(x_ref[...], w_ref[...],
                            preferred_element_type=jnp.float32)

    @pl.when(k == pl.num_programs(2) - 1)
    def _():
        y = acc_ref[...] + b_ref[...].astype(jnp.float32)
        if activation == "gelu":
            y = _gelu(y)
        if has_residual:
            y = y + res_ref[...].astype(jnp.float32)
        o_ref[...] = y.astype(o_ref.dtype)


def _ln_matmul_kernel(x_ref, w_ref, b_ref, g_ref, bt_ref, o_ref, xn_ref, *,
                      activation):
    """o = act(LayerNorm(x) @ w + b).

    LayerNorm needs the full K per row, so K is not tiled.  The normalized tile
    is computed ONCE per row tile (at the first N step) into a VMEM scratch and
    reused across the innermost 'arbitrary' N axis — no per-N-tile LN recompute."""
    j = pl.program_id(1)

    @pl.when(j == 0)
    def _():
        x = x_ref[...].astype(jnp.float32)
        mean = jnp.mean(x, axis=-1, keepdims=True)
        var = jnp.mean(jnp.square(x - mean), axis=-1, keepdims=True)
        xn = (x - mean) * jax.lax.rsqrt(var + LN_EPS)
        xn = xn * g_ref[...].astype(jnp.float32) + bt_ref[...].astype(jnp.float32)
        xn_ref[...] = xn.astype(xn_ref.dtype)

    y = jnp.dot(xn_ref[...], w_ref[...], preferred_element_type=jnp.float32)
    y = y + b_ref[...].astype(jnp.float32)
    if activation == "gelu":
        y = _gelu(y)
    o_ref[...] = y.astype(o_ref.dtype)


def _layernorm_kernel(x_ref, g_ref, b_ref, o_ref):
    x = x_ref[...].astype(jnp.float32)
    mean = jnp.mean(x, axis=-1, keepdims=True)
    var = jnp.mean(jnp.square(x - mean), axis=-1, keepdims=True)
    y = (x - mean) * jax.lax.rsqrt(var + LN_EPS)
    y = y * g_ref[...].astype(jnp.float32) + b_ref[...].astype(jnp.float32)
    o_ref[...] = y.astype(o_ref.dtype)


def _flash_attn_kernel(q_ref, k_ref, v_ref, bias_ref, o_ref, m_sc, l_sc, acc_sc):
    """Online-softmax attention for one (batch, head); KV tiles on the last grid
    axis.  The 1/sqrt(Dh) scale is pre-folded into the Q projection weights."""
    ki = pl.program_id(3)

    @pl.when(ki == 0)
    def _():
        m_sc[...] = jnp.full_like(m_sc, -jnp.inf)
        l_sc[...] = jnp.zeros_like(l_sc)
        acc_sc[...] = jnp.zeros_like(acc_sc)

    # (tq, Dh) x (tkv, Dh) contracted on Dh -> (tq, tkv); bf16 operands, f32 accumulate.
    s = jax.lax.dot_general(q_ref[...], k_ref[...],
                            (((1,), (1,)), ((), ())),
                            preferred_element_type=jnp.float32)
    s = s + bias_ref[...].astype(jnp.float32)          # key-padding bias, (1, tkv)

    m_prev = m_sc[...]
    m_new = jnp.maximum(m_prev, jnp.max(s, axis=-1, keepdims=True))
    alpha = jnp.exp(m_prev - m_new)
    p = jnp.exp(s - m_new)
    l_sc[...] = alpha * l_sc[...] + jnp.sum(p, axis=-1, keepdims=True)
    acc_sc[...] = alpha * acc_sc[...] + jax.lax.dot_general(
        p.astype(v_ref.dtype), v_ref[...],
        (((1,), (0,)), ((), ())), preferred_element_type=jnp.float32)
    m_sc[...] = m_new

    @pl.when(ki == pl.num_programs(3) - 1)
    def _():
        inv_l = pl.reciprocal(l_sc[...], approx=True)   # EUP slot, off the VPU
        o_ref[...] = (acc_sc[...] * inv_l).astype(o_ref.dtype)


# ----------------------------------------------------------------------------
# pallas_call wrappers
# ----------------------------------------------------------------------------
def matmul(x2d, w_t, b, residual=None, activation=None, out_dtype=None,
           tm=512, tn=512, tk=512):
    """y = [residual +] act(x2d @ w_t + b); w_t is pre-transposed to (K, N)."""
    M, K = x2d.shape
    Kw, N = w_t.shape
    assert K == Kw
    out_dtype = out_dtype or x2d.dtype
    tm, Mp = _m_tile_and_pad(M, tm)
    tn = _choose_divisor_tile(N, tn, 128)
    tk = _choose_divisor_tile(K, tk, 128)
    has_residual = residual is not None
    kern = functools.partial(_matmul_kernel, activation=activation,
                             has_residual=has_residual)
    in_specs = [
        pl.BlockSpec((tm, tk), lambda i, j, k: (i, k)),
        pl.BlockSpec((tk, tn), lambda i, j, k: (k, j)),
        pl.BlockSpec((1, tn), lambda i, j, k: (0, j)),
    ]
    args = [_pad_rows(x2d, Mp), w_t, b.reshape(1, N)]
    if has_residual:
        in_specs.append(pl.BlockSpec((tm, tn), lambda i, j, k: (i, j)))
        args.append(_pad_rows(residual, Mp))
    out = pl.pallas_call(
        kern,
        out_shape=jax.ShapeDtypeStruct((Mp, N), out_dtype),
        grid=(Mp // tm, N // tn, K // tk),
        in_specs=in_specs,
        out_specs=pl.BlockSpec((tm, tn), lambda i, j, k: (i, j)),
        scratch_shapes=[pltpu.VMEM((tm, tn), jnp.float32)],
        compiler_params=pltpu.CompilerParams(
            dimension_semantics=("parallel", "parallel", "arbitrary"),
            vmem_limit_bytes=GEMM_VMEM_LIMIT),
    )(*args)
    return out[:M] if Mp != M else out


def ln_linear(x2d, w_t, b, gamma, beta, activation=None, out_dtype=None,
              tm=512, tn=512):
    """y = act(LayerNorm(x2d) @ w_t + b); LN fused, computed once per row tile."""
    M, K = x2d.shape
    Kw, N = w_t.shape
    assert K == Kw
    out_dtype = out_dtype or x2d.dtype
    tm, Mp = _m_tile_and_pad(M, tm)
    tn = _choose_divisor_tile(N, tn, 128)
    kern = functools.partial(_ln_matmul_kernel, activation=activation)
    out = pl.pallas_call(
        kern,
        out_shape=jax.ShapeDtypeStruct((Mp, N), out_dtype),
        grid=(Mp // tm, N // tn),
        in_specs=[
            pl.BlockSpec((tm, K), lambda i, j: (i, 0)),
            pl.BlockSpec((K, tn), lambda i, j: (0, j)),
            pl.BlockSpec((1, tn), lambda i, j: (0, j)),
            pl.BlockSpec((1, K), lambda i, j: (0, 0)),
            pl.BlockSpec((1, K), lambda i, j: (0, 0)),
        ],
        out_specs=pl.BlockSpec((tm, tn), lambda i, j: (i, j)),
        scratch_shapes=[pltpu.VMEM((tm, K), w_t.dtype)],   # cached normalized rows
        compiler_params=pltpu.CompilerParams(
            # N axis is innermost and 'arbitrary' so the scratch written at j == 0
            # stays valid across the j sweep (megacore only shards the row axis).
            dimension_semantics=("parallel", "arbitrary"),
            vmem_limit_bytes=GEMM_VMEM_LIMIT),
    )(_pad_rows(x2d, Mp), w_t, b.reshape(1, N),
      gamma.reshape(1, K), beta.reshape(1, K))
    return out[:M] if Mp != M else out


def layernorm(x2d, gamma, beta, tm=512):
    M, D = x2d.shape
    tm, Mp = _m_tile_and_pad(M, tm)
    out = pl.pallas_call(
        _layernorm_kernel,
        out_shape=jax.ShapeDtypeStruct((Mp, D), x2d.dtype),
        grid=(Mp // tm,),
        in_specs=[
            pl.BlockSpec((tm, D), lambda i: (i, 0)),
            pl.BlockSpec((1, D), lambda i: (0, 0)),
            pl.BlockSpec((1, D), lambda i: (0, 0)),
        ],
        out_specs=pl.BlockSpec((tm, D), lambda i: (i, 0)),
        compiler_params=pltpu.CompilerParams(dimension_semantics=("parallel",)),
    )(_pad_rows(x2d, Mp), gamma.reshape(1, D), beta.reshape(1, D))
    return out[:M] if Mp != M else out


def flash_attention(q, k, v, key_pad_bias, tq=256, tkv=128):
    """q, k, v: (B, H, S, Dh); key_pad_bias: (B, 1, S) additive f32 bias.
    tkv=128 keeps the live (tq, tkv) f32 score/p tiles well inside the 64-vreg file."""
    B, H, S, Dh = q.shape
    tq = _choose_divisor_tile(S, tq, 16)
    tkv = _choose_divisor_tile(S, tkv, 128)
    # Leading singleton dims are squeezed (None) so the kernel sees (tq, Dh) refs
    # directly, avoiding in-kernel reshapes.
    qo_spec = pl.BlockSpec((None, None, tq, Dh), lambda b, h, qi, ki: (b, h, qi, 0))
    kv_spec = pl.BlockSpec((None, None, tkv, Dh), lambda b, h, qi, ki: (b, h, ki, 0))
    return pl.pallas_call(
        _flash_attn_kernel,
        out_shape=jax.ShapeDtypeStruct((B, H, S, Dh), q.dtype),
        grid=(B, H, S // tq, S // tkv),
        in_specs=[
            qo_spec, kv_spec, kv_spec,
            pl.BlockSpec((None, 1, tkv), lambda b, h, qi, ki: (b, 0, ki)),
        ],
        out_specs=qo_spec,
        scratch_shapes=[
            pltpu.VMEM((tq, 1), jnp.float32),    # running max
            pltpu.VMEM((tq, 1), jnp.float32),    # running denominator
            pltpu.VMEM((tq, Dh), jnp.float32),   # output accumulator
        ],
        compiler_params=pltpu.CompilerParams(
            dimension_semantics=("parallel", "parallel", "parallel", "arbitrary")),
    )(q, k, v, key_pad_bias)


# ----------------------------------------------------------------------------
# Model (ESM-1b / 'roberta_large' branch of BioBertModel)
# ----------------------------------------------------------------------------
def attention_block(x, p, heads, key_pad_bias):
    """Pre-LN multi-head self-attention: fused LN+QKV, flash core, fused residual."""
    B, S, D = x.shape
    Dh = D // heads
    x2 = x.reshape(B * S, D)
    qkv = ln_linear(x2, p["wqkv_t"], p["bqkv"], p["ln1_g"], p["ln1_b"])    # (B*S, 3D)
    # TODO(synk): fold the head split/merge into the flash BlockSpecs (needs 128-lane
    # head groups to keep lane-dense blocks) to drop these two XLA transposes.
    qkv = qkv.reshape(B, S, 3, heads, Dh).transpose(2, 0, 3, 1, 4)          # (3,B,H,S,Dh)
    o = flash_attention(qkv[0], qkv[1], qkv[2], key_pad_bias)               # (B,H,S,Dh)
    o = o.transpose(0, 2, 1, 3).reshape(B * S, D)
    out = matmul(o, p["wo_t"], p["bo"], residual=x2)                        # residual fused
    return out.reshape(B, S, D)


def ffn_block(x, p):
    B, S, D = x.shape
    x2 = x.reshape(B * S, D)
    h = ln_linear(x2, p["fc1_t"], p["fc1_b"], p["ln2_g"], p["ln2_b"],
                  activation="gelu")
    out = matmul(h, p["fc2_t"], p["fc2_b"], residual=x2)                    # residual fused
    return out.reshape(B, S, D)


def transformer_layer(x, p, heads, key_pad_bias):
    x = attention_block(x, p, heads, key_pad_bias)
    x = ffn_block(x, p)
    return x


def biobert_forward(tokens, params, cfg, repr_layers=()):
    """ESM-1b BioBertModel.forward: logits + requested hidden representations."""
    assert tokens.ndim == 2
    B, S = tokens.shape
    D, V = cfg["embed_dim"], cfg["vocab"]
    pad_idx = cfg["padding_idx"]
    padding_mask = tokens == pad_idx

    # embed_scale = 1 for ESM-1b
    x = jnp.take(params["embed_tokens"], tokens, axis=0)                    # (B, S, D)
    # TODO(synk): token_dropout rescaling branch not implemented (disabled by default).

    # LearnedPositionalEmbedding
    mask = (tokens != pad_idx).astype(jnp.int32)
    positions = jnp.cumsum(mask, axis=1) * mask + pad_idx
    x = x + jnp.take(params["embed_positions"], positions, axis=0)

    # emb_layer_norm_before is None (emb_layer_norm_before=False)
    x = x * (1.0 - padding_mask[..., None].astype(x.dtype))

    repr_layers = set(repr_layers)
    hidden_representations = {}
    if 0 in repr_layers:
        hidden_representations[0] = x

    # Additive key-padding bias: large negative on padded keys, zero otherwise
    # (equivalent to the reference dropping the mask when no padding exists).
    key_pad_bias = jnp.where(padding_mask, -1e9, 0.0).astype(jnp.float32)
    key_pad_bias = key_pad_bias.reshape(B, 1, S)

    n_layers = cfg["layers"]
    for layer_idx in range(n_layers):
        x = transformer_layer(x, params["layers"][layer_idx], cfg["heads"],
                              key_pad_bias)
        if layer_idx + 1 in repr_layers:
            hidden_representations[layer_idx + 1] = x

    x2 = x.reshape(B * S, D)
    if n_layers in repr_layers:
        # Reference stores the post-emb_layer_norm_after activations at this index.
        hidden_representations[n_layers] = layernorm(
            x2, params["ln_after_g"], params["ln_after_b"]).reshape(B, S, D)

    # RobertaLMHead: emb_layer_norm_after fused into its dense projection,
    # lm layer_norm fused into the tied-weight (lane-padded) vocab projection.
    h = ln_linear(x2, params["lm_dense_t"], params["lm_dense_b"],
                  params["ln_after_g"], params["ln_after_b"], activation="gelu")
    logits = ln_linear(h, params["lm_head_w_t"], params["lm_head_b"],
                       params["lm_ln_g"], params["lm_ln_b"],
                       out_dtype=jnp.float32)
    logits = logits[:, :V].reshape(B, S, V)   # drop the lane-padding columns

    # TODO(synk): need_head_weights / return_contacts (ContactPredictionHead) not implemented.
    return {"logits": logits, "representations": hidden_representations}


# ----------------------------------------------------------------------------
# Parameter init (PyTorch layout) + conversion to kernel layout
# ----------------------------------------------------------------------------
def init_params(key, cfg):
    """Deterministic init in PyTorch layout (nn.Linear weights are (out, in))."""
    D, F, V = cfg["embed_dim"], cfg["ffn_dim"], cfg["vocab"]
    keys = iter(jax.random.split(key, 8 + 8 * cfg["layers"]))

    def nrm(shape):
        return jax.random.normal(next(keys), shape, jnp.float32) * 0.02

    embed_tokens = nrm((V, D)).at[cfg["padding_idx"]].set(0.0)
    n_pos = cfg["max_positions"] + cfg["padding_idx"] + 1
    embed_positions = nrm((n_pos, D)).at[cfg["padding_idx"]].set(0.0)

    layers = []
    for _ in range(cfg["layers"]):
        layers.append(dict(
            ln1_g=jnp.ones((D,), jnp.float32), ln1_b=jnp.zeros((D,), jnp.float32),
            wq=nrm((D, D)), bq=jnp.zeros((D,), jnp.float32),
            wk=nrm((D, D)), bk=jnp.zeros((D,), jnp.float32),
            wv=nrm((D, D)), bv=jnp.zeros((D,), jnp.float32),
            wo=nrm((D, D)), bo=jnp.zeros((D,), jnp.float32),
            ln2_g=jnp.ones((D,), jnp.float32), ln2_b=jnp.zeros((D,), jnp.float32),
            fc1_w=nrm((F, D)), fc1_b=jnp.zeros((F,), jnp.float32),
            fc2_w=nrm((D, F)), fc2_b=jnp.zeros((D,), jnp.float32),
        ))

    return dict(
        embed_tokens=embed_tokens,
        embed_positions=embed_positions,
        layers=layers,
        ln_after_g=jnp.ones((D,), jnp.float32), ln_after_b=jnp.zeros((D,), jnp.float32),
        lm_dense_w=nrm((D, D)), lm_dense_b=jnp.zeros((D,), jnp.float32),
        lm_ln_g=jnp.ones((D,), jnp.float32), lm_ln_b=jnp.zeros((D,), jnp.float32),
        lm_bias=jnp.zeros((V,), jnp.float32),
    )


def prepare_params(p, cfg, dtype=COMPUTE_DTYPE):
    """PyTorch-layout -> kernel layout: (K, N) pre-transposed bf16 matmul weights,
    fused QKV with the 1/sqrt(Dh) softmax scale folded into the Q third,
    lane-padded tied LM head. LayerNorm params and biases stay f32."""
    D, V, H = cfg["embed_dim"], cfg["vocab"], cfg["heads"]
    scale = (D // H) ** -0.5
    Vp = _round_up(V, 128)

    def c(a):
        return a.astype(dtype)

    layers = []
    for lp in p["layers"]:
        # Fold softmax scale into Q projection: (s*q)·k == s*(q·k).
        wqkv = jnp.concatenate([lp["wq"] * scale, lp["wk"], lp["wv"]], axis=0)  # (3D, D)
        bqkv = jnp.concatenate([lp["bq"] * scale, lp["bk"], lp["bv"]], axis=0)  # (3D,)
        layers.append(dict(
            ln1_g=lp["ln1_g"], ln1_b=lp["ln1_b"],
            wqkv_t=c(wqkv.T), bqkv=bqkv,
            wo_t=c(lp["wo"].T), bo=lp["bo"],
            ln2_g=lp["ln2_g"], ln2_b=lp["ln2_b"],
            fc1_t=c(lp["fc1_w"].T), fc1_b=lp["fc1_b"],
            fc2_t=c(lp["fc2_w"].T), fc2_b=lp["fc2_b"],
        ))

    # Tied LM-head weight: pad the vocab axis to a multiple of 128 so the final
    # matmul stores are lane-dense; padded logit columns are sliced off afterwards.
    w_lm = jnp.zeros((Vp, D), jnp.float32).at[:V].set(p["embed_tokens"])
    b_lm = jnp.zeros((Vp,), jnp.float32).at[:V].set(p["lm_bias"])

    return dict(
        embed_tokens=c(p["embed_tokens"]),
        embed_positions=c(p["embed_positions"]),
        layers=layers,
        ln_after_g=p["ln_after_g"], ln_after_b=p["ln_after_b"],
        lm_dense_t=c(p["lm_dense_w"].T), lm_dense_b=p["lm_dense_b"],
        lm_ln_g=p["lm_ln_g"], lm_ln_b=p["lm_ln_b"],
        lm_head_w_t=c(w_lm.T), lm_head_b=b_lm,
    )


# ----------------------------------------------------------------------------
if __name__ == "__main__":
    cfg = dict(
        vocab=33,          # ESM alphabet size
        padding_idx=1,
        embed_dim=32,
        ffn_dim=64,
        heads=4,
        layers=2,
        max_positions=64,
    )
    key = jax.random.PRNGKey(0)
    params = prepare_params(init_params(key, cfg), cfg)

    # batch=2, seq=8; tokens chosen away from padding_idx (no-padding fast path,
    # matching the reference's `padding_mask = None` branch).
    tokens = jax.random.randint(jax.random.fold_in(key, 7), (2, 8), 4, 24,
                                dtype=jnp.int32)

    fwd = jax.jit(lambda toks, prms: biobert_forward(
        toks, prms, cfg, repr_layers=(0, cfg["layers"])))
    out = fwd(tokens, params)
    logits = jax.block_until_ready(out["logits"])

    assert logits.shape == (2, 8, cfg["vocab"])
    assert bool(jnp.all(jnp.isfinite(logits)))
    assert out["representations"][cfg["layers"]].shape == (2, 8, cfg["embed_dim"])
    print("KERNEL_OK")
</pallas_src>

<mosaic_0001>
module attributes {stable_mosaic.version = 11 : i64} {
  func.func @_ln_matmul_kernel(%arg0: i32, %arg1: i32, %arg2: memref<16x32xbf16, #tpu.memory_space<vmem>>, %arg3: memref<32x64xbf16, #tpu.memory_space<vmem>>, %arg4: memref<1x64xf32, #tpu.memory_space<vmem>>, %arg5: memref<1x32xf32, #tpu.memory_space<vmem>>, %arg6: memref<1x32xf32, #tpu.memory_space<vmem>>, %arg7: memref<16x64xbf16, #tpu.memory_space<vmem>>, %arg8: memref<16x32xbf16, #tpu.memory_space<vmem>>) attributes {dimension_semantics = [#tpu.dimension_semantics<parallel>, #tpu.dimension_semantics<arbitrary>], iteration_bounds = array<i64: 1, 1>, scalar_prefetch = 0 : i64, scratch_operands = 1 : i64, tpu.core_type = #tpu.core_type<tc>, window_params = [{transform_indices = @transform_0, window_bounds = array<i64: 16, 32>}, {transform_indices = @transform_1, window_bounds = array<i64: 32, 64>}, {transform_indices = @transform_2, window_bounds = array<i64: 1, 64>}, {pipeline_mode = #tpu.pipeline_mode<synchronous>, transform_indices = @transform_3, window_bounds = array<i64: 1, 32>}, {pipeline_mode = #tpu.pipeline_mode<synchronous>, transform_indices = @transform_4, window_bounds = array<i64: 1, 32>}, {transform_indices = @transform_5, window_bounds = array<i64: 16, 64>}]} {
    %c0_i32 = arith.constant 0 : i32
    %0 = arith.cmpi eq, %arg1, %c0_i32 : i32
    %1 = arith.extui %0 : i1 to i32
    %c0_i32_0 = arith.constant 0 : i32
    %2 = arith.cmpi ne, %1, %c0_i32_0 : i32
    scf.if %2 {
      %c0_11 = arith.constant 0 : index
      %c0_12 = arith.constant 0 : index
      %19 = vector.load %arg2[%c0_11, %c0_12] : memref<16x32xbf16, #tpu.memory_space<vmem>>, vector<16x32xbf16>
      %20 = arith.extf %19 : vector<16x32xbf16> to vector<16x32xf32>
      %cst_13 = arith.constant dense<0.000000e+00> : vector<16xf32>
      %21 = vector.multi_reduction <add>, %20, %cst_13 [1] : vector<16x32xf32> to vector<16xf32>
      %22 = vector.shape_cast %21 : vector<16xf32> to vector<16x1xf32>
      %cst_14 = arith.constant 3.200000e+01 : f32
      %23 = vector.broadcast %cst_14 : f32 to vector<16x1xf32>
      %24 = arith.divf %22, %23 : vector<16x1xf32>
      %25 = vector.broadcast %24 : vector<16x1xf32> to vector<16x32xf32>
      %26 = arith.subf %20, %25 : vector<16x32xf32>
      %27 = arith.mulf %26, %26 : vector<16x32xf32>
      %cst_15 = arith.constant dense<0.000000e+00> : vector<16xf32>
      %28 = vector.multi_reduction <add>, %27, %cst_15 [1] : vector<16x32xf32> to vector<16xf32>
      %29 = vector.shape_cast %28 : vector<16xf32> to vector<16x1xf32>
      %cst_16 = arith.constant 3.200000e+01 : f32
      %30 = vector.broadcast %cst_16 : f32 to vector<16x1xf32>
      %31 = arith.divf %29, %30 : vector<16x1xf32>
      %32 = vector.broadcast %24 : vector<16x1xf32> to vector<16x32xf32>
      %33 = arith.subf %20, %32 : vector<16x32xf32>
      %cst_17 = arith.constant 9.99999996E-13 : f32
      %34 = vector.broadcast %cst_17 : f32 to vector<16x1xf32>
      %35 = arith.addf %31, %34 : vector<16x1xf32>
      %36 = math.rsqrt %35 : vector<16x1xf32>
      %37 = vector.broadcast %36 : vector<16x1xf32> to vector<16x32xf32>
      %38 = arith.mulf %33, %37 : vector<16x32xf32>
      %c0_18 = arith.constant 0 : index
      %c0_19 = arith.constant 0 : index
      %39 = vector.load %arg5[%c0_18, %c0_19] : memref<1x32xf32, #tpu.memory_space<vmem>>, vector<1x32xf32>
      %40 = vector.broadcast %39 : vector<1x32xf32> to vector<16x32xf32>
      %41 = arith.mulf %38, %40 : vector<16x32xf32>
      %c0_20 = arith.constant 0 : index
      %c0_21 = arith.constant 0 : index
      %42 = vector.load %arg6[%c0_20, %c0_21] : memref<1x32xf32, #tpu.memory_space<vmem>>, vector<1x32xf32>
      %43 = vector.broadcast %42 : vector<1x32xf32> to vector<16x32xf32>
      %44 = arith.addf %41, %43 : vector<16x32xf32>
      %45 = arith.truncf %44 : vector<16x32xf32> to vector<16x32xbf16>
      %c0_22 = arith.constant 0 : index
      %c0_23 = arith.constant 0 : index
      %46 = vector.load %arg8[%c0_22, %c0_23] : memref<16x32xbf16, #tpu.memory_space<vmem>>, vector<16x32xbf16>
      tpu.vector_store %arg8[%c0_22, %c0_23], %45 {strides = array<i32>} : memref<16x32xbf16, #tpu.memory_space<vmem>>, vector<16x32xbf16>,
    } else {
    }
    %c0 = arith.constant 0 : index
    %c0_1 = arith.constant 0 : index
    %3 = vector.load %arg8[%c0, %c0_1] : memref<16x32xbf16, #tpu.memory_space<vmem>>, vector<16x32xbf16>
    %c0_2 = arith.constant 0 : index
    %c0_3 = arith.constant 0 : index
    %4 = vector.load %arg3[%c0_2, %c0_3] : memref<32x64xbf16, #tpu.memory_space<vmem>>, vector<32x64xbf16>
    %cst = arith.constant dense<0.000000e+00> : vector<16x64xf32>
    %5 = tpu.matmul %3, %4, %cst {dimension_numbers = #tpu.dot_dimension_numbers<[1], [0], [0], [1], [0, 0, 1, 1], [], []>} : vector<16x32xbf16>, vector<32x64xbf16>, vector<16x64xf32> -> vector<16x64xf32>
    %c0_4 = arith.constant 0 : index
    %c0_5 = arith.constant 0 : index
    %6 = vector.load %arg4[%c0_4, %c0_5] : memref<1x64xf32, #tpu.memory_space<vmem>>, vector<1x64xf32>
    %7 = vector.broadcast %6 : vector<1x64xf32> to vector<16x64xf32>
    %8 = arith.addf %5, %7 : vector<16x64xf32>
    %cst_6 = arith.constant 5.000000e-01 : f32
    %9 = vector.broadcast %cst_6 : f32 to vector<16x64xf32>
    %10 = arith.mulf %8, %9 : vector<16x64xf32>
    %cst_7 = arith.constant 1.41421354 : f32
    %11 = vector.broadcast %cst_7 : f32 to vector<16x64xf32>
    %12 = arith.divf %8, %11 : vector<16x64xf32>
    %13 = math.erf %12 : vector<16x64xf32>
    %cst_8 = arith.constant 1.000000e+00 : f32
    %14 = vector.broadcast %cst_8 : f32 to vector<16x64xf32>
    %15 = arith.addf %14, %13 : vector<16x64xf32>
    %16 = arith.mulf %10, %15 : vector<16x64xf32>
    %17 = arith.truncf %16 : vector<16x64xf32> to vector<16x64xbf16>
    %c0_9 = arith.constant 0 : index
    %c0_10 = arith.constant 0 : index
    %18 = vector.load %arg7[%c0_9, %c0_10] : memref<16x64xbf16, #tpu.memory_space<vmem>>, vector<16x64xbf16>
    tpu.vector_store %arg7[%c0_9, %c0_10], %17 {strides = array<i32>} : memref<16x64xbf16, #tpu.memory_space<vmem>>, vector<16x64xbf16>,
    return
  }
  func.func @transform_0(%arg0: i32, %arg1: i32) -> (i32, i32) {
    %c0_i32 = arith.constant 0 : i32
    %c0_i32_0 = arith.constant 0 : i32
    return %arg0, %c0_i32 : i32, i32
  }
  func.func @transform_1(%arg0: i32, %arg1: i32) -> (i32, i32) {
    %c0_i32 = arith.constant 0 : i32
    %c0_i32_0 = arith.constant 0 : i32
    return %c0_i32, %arg1 : i32, i32
  }
  func.func @transform_2(%arg0: i32, %arg1: i32) -> (i32, i32) {
    %c0_i32 = arith.constant 0 : i32
    %c0_i32_0 = arith.constant 0 : i32
    return %c0_i32, %arg1 : i32, i32
  }
  func.func @transform_3(%arg0: i32, %arg1: i32) -> (i32, i32) {
    %c0_i32 = arith.constant 0 : i32
    %c0_i32_0 = arith.constant 0 : i32
    %c0_i32_1 = arith.constant 0 : i32
    return %c0_i32, %c0_i32_0 : i32, i32
  }
  func.func @transform_4(%arg0: i32, %arg1: i32) -> (i32, i32) {
    %c0_i32 = arith.constant 0 : i32
    %c0_i32_0 = arith.constant 0 : i32
    %c0_i32_1 = arith.constant 0 : i32
    return %c0_i32, %c0_i32_0 : i32, i32
  }
  func.func @transform_5(%arg0: i32, %arg1: i32) -> (i32, i32) {
    %c0_i32 = arith.constant 0 : i32
    return %arg0, %arg1 : i32, i32
  }
}

module attributes {stable_mosaic.version = 11 : i64} {
  func.func @_ln_matmul_kernel(%arg0: i32, %arg1: i32, %arg2: memref<16x32xbf16, #tpu.memory_space<vmem>>, %arg3: memref<32x96xbf16, #tpu.memory_space<vmem>>, %arg4: memref<1x96xf32, #tpu.memory_space<vmem>>, %arg5: memref<1x32xf32, #tpu.memory_space<vmem>>, %arg6: memref<1x32xf32, #tpu.memory_space<vmem>>, %arg7: memref<16x96xbf16, #tpu.memory_space<vmem>>, %arg8: memref<16x32xbf16, #tpu.memory_space<vmem>>) attributes {dimension_semantics = [#tpu.dimension_semantics<parallel>, #tpu.dimension_semantics<arbitrary>], iteration_bounds = array<i64: 1, 1>, scalar_prefetch = 0 : i64, scratch_operands = 1 : i64, tpu.core_type = #tpu.core_type<tc>, window_params = [{transform_indices = @transform_0, window_bounds = array<i64: 16, 32>}, {transform_indices = @transform_1, window_bounds = array<i64: 32, 96>}, {transform_indices = @transform_2, window_bounds = array<i64: 1, 96>}, {pipeline_mode = #tpu.pipeline_mode<synchronous>, transform_indices = @transform_3, window_bounds = array<i64: 1, 32>}, {pipeline_mode = #tpu.pipeline_mode<synchronous>, transform_indices = @transform_4, window_bounds = array<i64: 1, 32>}, {transform_indices = @transform_5, window_bounds = array<i64: 16, 96>}]} {
    %c0_i32 = arith.constant 0 : i32
    %0 = arith.cmpi eq, %arg1, %c0_i32 : i32
    %1 = arith.extui %0 : i1 to i32
    %c0_i32_0 = arith.constant 0 : i32
    %2 = arith.cmpi ne, %1, %c0_i32_0 : i32
    scf.if %2 {
      %c0_8 = arith.constant 0 : index
      %c0_9 = arith.constant 0 : index
      %11 = vector.load %arg2[%c0_8, %c0_9] : memref<16x32xbf16, #tpu.memory_space<vmem>>, vector<16x32xbf16>
      %12 = arith.extf %11 : vector<16x32xbf16> to vector<16x32xf32>
      %cst_10 = arith.constant dense<0.000000e+00> : vector<16xf32>
      %13 = vector.multi_reduction <add>, %12, %cst_10 [1] : vector<16x32xf32> to vector<16xf32>
      %14 = vector.shape_cast %13 : vector<16xf32> to vector<16x1xf32>
      %cst_11 = arith.constant 3.200000e+01 : f32
      %15 = vector.broadcast %cst_11 : f32 to vector<16x1xf32>
      %16 = arith.divf %14, %15 : vector<16x1xf32>
      %17 = vector.broadcast %16 : vector<16x1xf32> to vector<16x32xf32>
      %18 = arith.subf %12, %17 : vector<16x32xf32>
      %19 = arith.mulf %18, %18 : vector<16x32xf32>
      %cst_12 = arith.constant dense<0.000000e+00> : vector<16xf32>
      %20 = vector.multi_reduction <add>, %19, %cst_12 [1] : vector<16x32xf32> to vector<16xf32>
      %21 = vector.shape_cast %20 : vector<16xf32> to vector<16x1xf32>
      %cst_13 = arith.constant 3.200000e+01 : f32
      %22 = vector.broadcast %cst_13 : f32 to vector<16x1xf32>
      %23 = arith.divf %21, %22 : vector<16x1xf32>
      %24 = vector.broadcast %16 : vector<16x1xf32> to vector<16x32xf32>
      %25 = arith.subf %12, %24 : vector<16x32xf32>
      %cst_14 = arith.constant 9.99999996E-13 : f32
      %26 = vector.broadcast %cst_14 : f32 to vector<16x1xf32>
      %27 = arith.addf %23, %26 : vector<16x1xf32>
      %28 = math.rsqrt %27 : vector<16x1xf32>
      %29 = vector.broadcast %28 : vector<16x1xf32> to vector<16x32xf32>
      %30 = arith.mulf %25, %29 : vector<16x32xf32>
      %c0_15 = arith.constant 0 : index
      %c0_16 = arith.constant 0 : index
      %31 = vector.load %arg5[%c0_15, %c0_16] : memref<1x32xf32, #tpu.memory_space<vmem>>, vector<1x32xf32>
      %32 = vector.broadcast %31 : vector<1x32xf32> to vector<16x32xf32>
      %33 = arith.mulf %30, %32 : vector<16x32xf32>
      %c0_17 = arith.constant 0 : index
      %c0_18 = arith.constant 0 : index
      %34 = vector.load %arg6[%c0_17, %c0_18] : memref<1x32xf32, #tpu.memory_space<vmem>>, vector<1x32xf32>
      %35 = vector.broadcast %34 : vector<1x32xf32> to vector<16x32xf32>
      %36 = arith.addf %33, %35 : vector<16x32xf32>
      %37 = arith.truncf %36 : vector<16x32xf32> to vector<16x32xbf16>
      %c0_19 = arith.constant 0 : index
      %c0_20 = arith.constant 0 : index
      %38 = vector.load %arg8[%c0_19, %c0_20] : memref<16x32xbf16, #tpu.memory_space<vmem>>, vector<16x32xbf16>
      tpu.vector_store %arg8[%c0_19, %c0_20], %37 {strides = array<i32>} : memref<16x32xbf16, #tpu.memory_space<vmem>>, vector<16x32xbf16>,
    } else {
    }
    %c0 = arith.constant 0 : index
    %c0_1 = arith.constant 0 : index
    %3 = vector.load %arg8[%c0, %c0_1] : memref<16x32xbf16, #tpu.memory_space<vmem>>, vector<16x32xbf16>
    %c0_2 = arith.constant 0 : index
    %c0_3 = arith.constant 0 : index
    %4 = vector.load %arg3[%c0_2, %c0_3] : memref<32x96xbf16, #tpu.memory_space<vmem>>, vector<32x96xbf16>
    %cst = arith.constant dense<0.000000e+00> : vector<16x96xf32>
    %5 = tpu.matmul %3, %4, %cst {dimension_numbers = #tpu.dot_dimension_numbers<[1], [0], [0], [1], [0, 0, 1, 1], [], []>} : vector<16x32xbf16>, vector<32x96xbf16>, vector<16x96xf32> -> vector<16x96xf32>
    %c0_4 = arith.constant 0 : index
    %c0_5 = arith.constant 0 : index
    %6 = vector.load %arg4[%c0_4, %c0_5] : memref<1x96xf32, #tpu.memory_space<vmem>>, vector<1x96xf32>
    %7 = vector.broadcast %6 : vector<1x96xf32> to vector<16x96xf32>
    %8 = arith.addf %5, %7 : vector<16x96xf32>
    %9 = arith.truncf %8 : vector<16x96xf32> to vector<16x96xbf16>
    %c0_6 = arith.constant 0 : index
    %c0_7 = arith.constant 0 : index
    %10 = vector.load %arg7[%c0_6, %c0_7] : memref<16x96xbf16, #tpu.memory_space<vmem>>, vector<16x96xbf16>
    tpu.vector_store %arg7[%c0_6, %c0_7], %9 {strides = array<i32>} : memref<16x96xbf16, #tpu.memory_space<vmem>>, vector<16x96xbf16>,
    return
  }
  func.func @transform_0(%arg0: i32, %arg1: i32) -> (i32, i32) {
    %c0_i32 = arith.constant 0 : i32
    %c0_i32_0 = arith.constant 0 : i32
    return %arg0, %c0_i32 : i32, i32
  }
  func.func @transform_1(%arg0: i32, %arg1: i32) -> (i32, i32) {
    %c0_i32 = arith.constant 0 : i32
    %c0_i32_0 = arith.constant 0 : i32
    return %c0_i32, %arg1 : i32, i32
  }
  func.func @transform_2(%arg0: i32, %arg1: i32) -> (i32, i32) {
    %c0_i32 = arith.constant 0 : i32
    %c0_i32_0 = arith.constant 0 : i32
    return %c0_i32, %arg1 : i32, i32
  }
  func.func @transform_3(%arg0: i32, %arg1: i32) -> (i32, i32) {
    %c0_i32 = arith.constant 0 : i32
    %c0_i32_0 = arith.constant 0 : i32
    %c0_i32_1 = arith.constant 0 : i32
    return %c0_i32, %c0_i32_0 : i32, i32
  }
  func.func @transform_4(%arg0: i32, %arg1: i32) -> (i32, i32) {
    %c0_i32 = arith.constant 0 : i32
    %c0_i32_0 = arith.constant 0 : i32
    %c0_i32_1 = arith.constant 0 : i32
    return %c0_i32, %c0_i32_0 : i32, i32
  }
  func.func @transform_5(%arg0: i32, %arg1: i32) -> (i32, i32) {
    %c0_i32 = arith.constant 0 : i32
    return %arg0, %arg1 : i32, i32
  }
}

module attributes {stable_mosaic.version = 11 : i64} {
  func.func @_flash_attn_kernel(%arg0: i32, %arg1: i32, %arg2: i32, %arg3: i32, %arg4: memref<1x1x8x8xbf16, #tpu.memory_space<vmem>>, %arg5: memref<1x1x8x8xbf16, #tpu.memory_space<vmem>>, %arg6: memref<1x1x8x8xbf16, #tpu.memory_space<vmem>>, %arg7: memref<1x1x8xf32, #tpu.memory_space<vmem>>, %arg8: memref<1x1x8x8xbf16, #tpu.memory_space<vmem>>, %arg9: memref<8x1xf32, #tpu.memory_space<vmem>>, %arg10: memref<8x1xf32, #tpu.memory_space<vmem>>, %arg11: memref<8x8xf32, #tpu.memory_space<vmem>>) attributes {dimension_semantics = [#tpu.dimension_semantics<parallel>, #tpu.dimension_semantics<parallel>, #tpu.dimension_semantics<parallel>, #tpu.dimension_semantics<arbitrary>], iteration_bounds = array<i64: 2, 4, 1, 1>, scalar_prefetch = 0 : i64, scratch_operands = 3 : i64, tpu.core_type = #tpu.core_type<tc>, window_params = [{transform_indices = @transform_0, window_bounds = array<i64: 1, 1, 8, 8>}, {transform_indices = @transform_1, window_bounds = array<i64: 1, 1, 8, 8>}, {transform_indices = @transform_2, window_bounds = array<i64: 1, 1, 8, 8>}, {transform_indices = @transform_3, window_bounds = array<i64: 1, 1, 8>}, {transform_indices = @transform_4, window_bounds = array<i64: 1, 1, 8, 8>}]} {
    %c0_i32 = arith.constant 0 : i32
    %0 = arith.cmpi eq, %arg3, %c0_i32 : i32
    %1 = arith.extui %0 : i1 to i32
    %c0_i32_0 = arith.constant 0 : i32
    %2 = arith.cmpi ne, %1, %c0_i32_0 : i32
    scf.if %2 {
      %cst_32 = arith.constant 0xFF800000 : f32
      %40 = vector.broadcast %cst_32 : f32 to vector<8x1xf32>
      %c0_33 = arith.constant 0 : index
      %c0_34 = arith.constant 0 : index
      %41 = vector.load %arg9[%c0_33, %c0_34] : memref<8x1xf32, #tpu.memory_space<vmem>>, vector<8x1xf32>
      tpu.vector_store %arg9[%c0_33, %c0_34], %40 {strides = array<i32>} : memref<8x1xf32, #tpu.memory_space<vmem>>, vector<8x1xf32>,
      %cst_35 = arith.constant 0.000000e+00 : f32
      %42 = vector.broadcast %cst_35 : f32 to vector<8x1xf32>
      %c0_36 = arith.constant 0 : index
      %c0_37 = arith.constant 0 : index
      %43 = vector.load %arg10[%c0_36, %c0_37] : memref<8x1xf32, #tpu.memory_space<vmem>>, vector<8x1xf32>
      tpu.vector_store %arg10[%c0_36, %c0_37], %42 {strides = array<i32>} : memref<8x1xf32, #tpu.memory_space<vmem>>, vector<8x1xf32>,
      %cst_38 = arith.constant 0.000000e+00 : f32
      %44 = vector.broadcast %cst_38 : f32 to vector<8x8xf32>
      %c0_39 = arith.constant 0 : index
      %c0_40 = arith.constant 0 : index
      %45 = vector.load %arg11[%c0_39, %c0_40] : memref<8x8xf32, #tpu.memory_space<vmem>>, vector<8x8xf32>
      tpu.vector_store %arg11[%c0_39, %c0_40], %44 {strides = array<i32>} : memref<8x8xf32, #tpu.memory_space<vmem>>, vector<8x8xf32>,
    } else {
    }
    %c0 = arith.constant 0 : index
    %c0_1 = arith.constant 0 : index
    %c0_2 = arith.constant 0 : index
    %c0_3 = arith.constant 0 : index
    %3 = vector.load %arg4[%c0, %c0_1, %c0_2, %c0_3] : memref<1x1x8x8xbf16, #tpu.memory_space<vmem>>, vector<1x1x8x8xbf16>
    %4 = vector.shape_cast %3 : vector<1x1x8x8xbf16> to vector<8x8xbf16>
    %c0_4 = arith.constant 0 : index
    %c0_5 = arith.constant 0 : index
    %c0_6 = arith.constant 0 : index
    %c0_7 = arith.constant 0 : index
    %5 = vector.load %arg5[%c0_4, %c0_5, %c0_6, %c0_7] : memref<1x1x8x8xbf16, #tpu.memory_space<vmem>>, vector<1x1x8x8xbf16>
    %6 = vector.shape_cast %5 : vector<1x1x8x8xbf16> to vector<8x8xbf16>
    %cst = arith.constant dense<0.000000e+00> : vector<8x8xf32>
    %7 = tpu.matmul %4, %6, %cst {dimension_numbers = #tpu.dot_dimension_numbers<[1], [1], [0], [0], [0, 0, 1, 0], [], []>} : vector<8x8xbf16>, vector<8x8xbf16>, vector<8x8xf32> -> vector<8x8xf32>
    %c0_8 = arith.constant 0 : index
    %c0_9 = arith.constant 0 : index
    %c0_10 = arith.constant 0 : index
    %8 = vector.load %arg7[%c0_8, %c0_9, %c0_10] : memref<1x1x8xf32, #tpu.memory_space<vmem>>, vector<1x1x8xf32>
    %9 = vector.shape_cast %8 : vector<1x1x8xf32> to vector<1x8xf32>
    %10 = vector.broadcast %9 : vector<1x8xf32> to vector<8x8xf32>
    %11 = arith.addf %7, %10 : vector<8x8xf32>
    %c0_11 = arith.constant 0 : index
    %c0_12 = arith.constant 0 : index
    %12 = vector.load %arg9[%c0_11, %c0_12] : memref<8x1xf32, #tpu.memory_space<vmem>>, vector<8x1xf32>
    %cst_13 = arith.constant dense<0xFF800000> : vector<8xf32>
    %13 = vector.multi_reduction <maximumf>, %11, %cst_13 [1] : vector<8x8xf32> to vector<8xf32>
    %14 = vector.shape_cast %13 : vector<8xf32> to vector<8x1xf32>
    %15 = arith.maximumf %12, %14 : vector<8x1xf32>
    %16 = arith.subf %12, %15 : vector<8x1xf32>
    %17 = math.exp %16 : vector<8x1xf32>
    %18 = vector.broadcast %15 : vector<8x1xf32> to vector<8x8xf32>
    %19 = arith.subf %11, %18 : vector<8x8xf32>
    %20 = math.exp %19 : vector<8x8xf32>
    %c0_14 = arith.constant 0 : index
    %c0_15 = arith.constant 0 : index
    %21 = vector.load %arg10[%c0_14, %c0_15] : memref<8x1xf32, #tpu.memory_space<vmem>>, vector<8x1xf32>
    %22 = arith.mulf %17, %21 : vector<8x1xf32>
    %cst_16 = arith.constant dense<0.000000e+00> : vector<8xf32>
    %23 = vector.multi_reduction <add>, %20, %cst_16 [1] : vector<8x8xf32> to vector<8xf32>
    %24 = vector.shape_cast %23 : vector<8xf32> to vector<8x1xf32>
    %25 = arith.addf %22, %24 : vector<8x1xf32>
    %c0_17 = arith.constant 0 : index
    %c0_18 = arith.constant 0 : index
    %26 = vector.load %arg10[%c0_17, %c0_18] : memref<8x1xf32, #tpu.memory_space<vmem>>, vector<8x1xf32>
    tpu.vector_store %arg10[%c0_17, %c0_18], %25 {strides = array<i32>} : memref<8x1xf32, #tpu.memory_space<vmem>>, vector<8x1xf32>,
    %c0_19 = arith.constant 0 : index
    %c0_20 = arith.constant 0 : index
    %27 = vector.load %arg11[%c0_19, %c0_20] : memref<8x8xf32, #tpu.memory_space<vmem>>, vector<8x8xf32>
    %28 = vector.broadcast %17 : vector<8x1xf32> to vector<8x8xf32>
    %29 = arith.mulf %28, %27 : vector<8x8xf32>
    %30 = arith.truncf %20 : vector<8x8xf32> to vector<8x8xbf16>
    %c0_21 = arith.constant 0 : index
    %c0_22 = arith.constant 0 : index
    %c0_23 = arith.constant 0 : index
    %c0_24 = arith.constant 0 : index
    %31 = vector.load %arg6[%c0_21, %c0_22, %c0_23, %c0_24] : memref<1x1x8x8xbf16, #tpu.memory_space<vmem>>, vector<1x1x8x8xbf16>
    %32 = vector.shape_cast %31 : vector<1x1x8x8xbf16> to vector<8x8xbf16>
    %cst_25 = arith.constant dense<0.000000e+00> : vector<8x8xf32>
    %33 = tpu.matmul %30, %32, %cst_25 {dimension_numbers = #tpu.dot_dimension_numbers<[1], [0], [0], [1], [0, 0, 1, 1], [], []>} : vector<8x8xbf16>, vector<8x8xbf16>, vector<8x8xf32> -> vector<8x8xf32>
    %34 = arith.addf %29, %33 : vector<8x8xf32>
    %c0_26 = arith.constant 0 : index
    %c0_27 = arith.constant 0 : index
    %35 = vector.load %arg11[%c0_26, %c0_27] : memref<8x8xf32, #tpu.memory_space<vmem>>, vector<8x8xf32>
    tpu.vector_store %arg11[%c0_26, %c0_27], %34 {strides = array<i32>} : memref<8x8xf32, #tpu.memory_space<vmem>>, vector<8x8xf32>,
    %c0_28 = arith.constant 0 : index
    %c0_29 = arith.constant 0 : index
    %36 = vector.load %arg9[%c0_28, %c0_29] : memref<8x1xf32, #tpu.memory_space<vmem>>, vector<8x1xf32>
    tpu.vector_store %arg9[%c0_28, %c0_29], %15 {strides = array<i32>} : memref<8x1xf32, #tpu.memory_space<vmem>>, vector<8x1xf32>,
    %c0_i32_30 = arith.constant 0 : i32
    %37 = arith.cmpi eq, %arg3, %c0_i32_30 : i32
    %38 = arith.extui %37 : i1 to i32
    %c0_i32_31 = arith.constant 0 : i32
    %39 = arith.cmpi ne, %38, %c0_i32_31 : i32
    scf.if %39 {
      %c0_32 = arith.constant 0 : index
      %c0_33 = arith.constant 0 : index
      %40 = vector.load %arg10[%c0_32, %c0_33] : memref<8x1xf32, #tpu.memory_space<vmem>>, vector<8x1xf32>
      %41 = tpu.reciprocal %40 {approx = true} : vector<8x1xf32> -> vector<8x1xf32>
      %c0_34 = arith.constant 0 : index
      %c0_35 = arith.constant 0 : index
      %42 = vector.load %arg11[%c0_34, %c0_35] : memref<8x8xf32, #tpu.memory_space<vmem>>, vector<8x8xf32>
      %43 = vector.broadcast %41 : vector<8x1xf32> to vector<8x8xf32>
      %44 = arith.mulf %42, %43 : vector<8x8xf32>
      %45 = arith.truncf %44 : vector<8x8xf32> to vector<8x8xbf16>
      %c0_36 = arith.constant 0 : index
      %c0_37 = arith.constant 0 : index
      %c0_38 = arith.constant 0 : index
      %c0_39 = arith.constant 0 : index
      %46 = vector.load %arg8[%c0_36, %c0_37, %c0_38, %c0_39] : memref<1x1x8x8xbf16, #tpu.memory_space<vmem>>, vector<1x1x8x8xbf16>
      %47 = vector.shape_cast %46 : vector<1x1x8x8xbf16> to vector<8x8xbf16>
      %48 = vector.shape_cast %45 : vector<8x8xbf16> to vector<1x1x8x8xbf16>
      tpu.vector_store %arg8[%c0_36, %c0_37, %c0_38, %c0_39], %48 {strides = array<i32>} : memref<1x1x8x8xbf16, #tpu.memory_space<vmem>>, vector<1x1x8x8xbf16>,
    } else {
    }
    return
  }
  func.func @transform_0(%arg0: i32, %arg1: i32, %arg2: i32, %arg3: i32) -> (i32, i32, i32, i32) {
    %c0_i32 = arith.constant 0 : i32
    %c0_i32_0 = arith.constant 0 : i32
    return %arg0, %arg1, %arg2, %c0_i32 : i32, i32, i32, i32
  }
  func.func @transform_1(%arg0: i32, %arg1: i32, %arg2: i32, %arg3: i32) -> (i32, i32, i32, i32) {
    %c0_i32 = arith.constant 0 : i32
    %c0_i32_0 = arith.constant 0 : i32
    return %arg0, %arg1, %arg3, %c0_i32 : i32, i32, i32, i32
  }
  func.func @transform_2(%arg0: i32, %arg1: i32, %arg2: i32, %arg3: i32) -> (i32, i32, i32, i32) {
    %c0_i32 = arith.constant 0 : i32
    %c0_i32_0 = arith.constant 0 : i32
    return %arg0, %arg1, %arg3, %c0_i32 : i32, i32, i32, i32
  }
  func.func @transform_3(%arg0: i32, %arg1: i32, %arg2: i32, %arg3: i32) -> (i32, i32, i32) {
    %c0_i32 = arith.constant 0 : i32
    %c0_i32_0 = arith.constant 0 : i32
    return %arg0, %c0_i32, %arg3 : i32, i32, i32
  }
  func.func @transform_4(%arg0: i32, %arg1: i32, %arg2: i32, %arg3: i32) -> (i32, i32, i32, i32) {
    %c0_i32 = arith.constant 0 : i32
    %c0_i32_0 = arith.constant 0 : i32
    return %arg0, %arg1, %arg2, %c0_i32 : i32, i32, i32, i32
  }
}

module attributes {stable_mosaic.version = 11 : i64} {
  func.func @_matmul_kernel(%arg0: i32, %arg1: i32, %arg2: i32, %arg3: memref<16x32xbf16, #tpu.memory_space<vmem>>, %arg4: memref<32x32xbf16, #tpu.memory_space<vmem>>, %arg5: memref<1x32xf32, #tpu.memory_space<vmem>>, %arg6: memref<16x32xbf16, #tpu.memory_space<vmem>>, %arg7: memref<16x32xbf16, #tpu.memory_space<vmem>>, %arg8: memref<16x32xf32, #tpu.memory_space<vmem>>) attributes {dimension_semantics = [#tpu.dimension_semantics<parallel>, #tpu.dimension_semantics<parallel>, #tpu.dimension_semantics<arbitrary>], iteration_bounds = array<i64: 1, 1, 1>, scalar_prefetch = 0 : i64, scratch_operands = 1 : i64, tpu.core_type = #tpu.core_type<tc>, window_params = [{transform_indices = @transform_0, window_bounds = array<i64: 16, 32>}, {transform_indices = @transform_1, window_bounds = array<i64: 32, 32>}, {transform_indices = @transform_2, window_bounds = array<i64: 1, 32>}, {transform_indices = @transform_3, window_bounds = array<i64: 16, 32>}, {transform_indices = @transform_4, window_bounds = array<i64: 16, 32>}]} {
    %c0_i32 = arith.constant 0 : i32
    %0 = arith.cmpi eq, %arg2, %c0_i32 : i32
    %1 = arith.extui %0 : i1 to i32
    %c0_i32_0 = arith.constant 0 : i32
    %2 = arith.cmpi ne, %1, %c0_i32_0 : i32
    scf.if %2 {
      %cst_10 = arith.constant 0.000000e+00 : f32
      %12 = vector.broadcast %cst_10 : f32 to vector<16x32xf32>
      %c0_11 = arith.constant 0 : index
      %c0_12 = arith.constant 0 : index
      %13 = vector.load %arg8[%c0_11, %c0_12] : memref<16x32xf32, #tpu.memory_space<vmem>>, vector<16x32xf32>
      tpu.vector_store %arg8[%c0_11, %c0_12], %12 {strides = array<i32>} : memref<16x32xf32, #tpu.memory_space<vmem>>, vector<16x32xf32>,
    } else {
    }
    %c0 = arith.constant 0 : index
    %c0_1 = arith.constant 0 : index
    %3 = vector.load %arg8[%c0, %c0_1] : memref<16x32xf32, #tpu.memory_space<vmem>>, vector<16x32xf32>
    %c0_2 = arith.constant 0 : index
    %c0_3 = arith.constant 0 : index
    %4 = vector.load %arg3[%c0_2, %c0_3] : memref<16x32xbf16, #tpu.memory_space<vmem>>, vector<16x32xbf16>
    %c0_4 = arith.constant 0 : index
    %c0_5 = arith.constant 0 : index
    %5 = vector.load %arg4[%c0_4, %c0_5] : memref<32x32xbf16, #tpu.memory_space<vmem>>, vector<32x32xbf16>
    %cst = arith.constant dense<0.000000e+00> : vector<16x32xf32>
    %6 = tpu.matmul %4, %5, %cst {dimension_numbers = #tpu.dot_dimension_numbers<[1], [0], [0], [1], [0, 0, 1, 1], [], []>} : vector<16x32xbf16>, vector<32x32xbf16>, vector<16x32xf32> -> vector<16x32xf32>
    %7 = arith.addf %3, %6 : vector<16x32xf32>
    %c0_6 = arith.constant 0 : index
    %c0_7 = arith.constant 0 : index
    %8 = vector.load %arg8[%c0_6, %c0_7] : memref<16x32xf32, #tpu.memory_space<vmem>>, vector<16x32xf32>
    tpu.vector_store %arg8[%c0_6, %c0_7], %7 {strides = array<i32>} : memref<16x32xf32, #tpu.memory_space<vmem>>, vector<16x32xf32>,
    %c0_i32_8 = arith.constant 0 : i32
    %9 = arith.cmpi eq, %arg2, %c0_i32_8 : i32
    %10 = arith.extui %9 : i1 to i32
    %c0_i32_9 = arith.constant 0 : i32
    %11 = arith.cmpi ne, %10, %c0_i32_9 : i32
    scf.if %11 {
      %c0_10 = arith.constant 0 : index
      %c0_11 = arith.constant 0 : index
      %12 = vector.load %arg8[%c0_10, %c0_11] : memref<16x32xf32, #tpu.memory_space<vmem>>, vector<16x32xf32>
      %c0_12 = arith.constant 0 : index
      %c0_13 = arith.constant 0 : index
      %13 = vector.load %arg5[%c0_12, %c0_13] : memref<1x32xf32, #tpu.memory_space<vmem>>, vector<1x32xf32>
      %14 = vector.broadcast %13 : vector<1x32xf32> to vector<16x32xf32>
      %15 = arith.addf %12, %14 : vector<16x32xf32>
      %c0_14 = arith.constant 0 : index
      %c0_15 = arith.constant 0 : index
      %16 = vector.load %arg6[%c0_14, %c0_15] : memref<16x32xbf16, #tpu.memory_space<vmem>>, vector<16x32xbf16>
      %17 = arith.extf %16 : vector<16x32xbf16> to vector<16x32xf32>
      %18 = arith.addf %15, %17 : vector<16x32xf32>
      %19 = arith.truncf %18 : vector<16x32xf32> to vector<16x32xbf16>
      %c0_16 = arith.constant 0 : index
      %c0_17 = arith.constant 0 : index
      %20 = vector.load %arg7[%c0_16, %c0_17] : memref<16x32xbf16, #tpu.memory_space<vmem>>, vector<16x32xbf16>
      tpu.vector_store %arg7[%c0_16, %c0_17], %19 {strides = array<i32>} : memref<16x32xbf16, #tpu.memory_space<vmem>>, vector<16x32xbf16>,
    } else {
    }
    return
  }
  func.func @transform_0(%arg0: i32, %arg1: i32, %arg2: i32) -> (i32, i32) {
    %c0_i32 = arith.constant 0 : i32
    return %arg0, %arg2 : i32, i32
  }
  func.func @transform_1(%arg0: i32, %arg1: i32, %arg2: i32) -> (i32, i32) {
    %c0_i32 = arith.constant 0 : i32
    return %arg2, %arg1 : i32, i32
  }
  func.func @transform_2(%arg0: i32, %arg1: i32, %arg2: i32) -> (i32, i32) {
    %c0_i32 = arith.constant 0 : i32
    %c0_i32_0 = arith.constant 0 : i32
    return %c0_i32, %arg1 : i32, i32
  }
  func.func @transform_3(%arg0: i32, %arg1: i32, %arg2: i32) -> (i32, i32) {
    %c0_i32 = arith.constant 0 : i32
    return %arg0, %arg1 : i32, i32
  }
  func.func @transform_4(%arg0: i32, %arg1: i32, %arg2: i32) -> (i32, i32) {
    %c0_i32 = arith.constant 0 : i32
    return %arg0, %arg1 : i32, i32
  }
}

module attributes {stable_mosaic.version = 11 : i64} {
  func.func @_matmul_kernel(%arg0: i32, %arg1: i32, %arg2: i32, %arg3: memref<16x64xbf16, #tpu.memory_space<vmem>>, %arg4: memref<64x32xbf16, #tpu.memory_space<vmem>>, %arg5: memref<1x32xf32, #tpu.memory_space<vmem>>, %arg6: memref<16x32xbf16, #tpu.memory_space<vmem>>, %arg7: memref<16x32xbf16, #tpu.memory_space<vmem>>, %arg8: memref<16x32xf32, #tpu.memory_space<vmem>>) attributes {dimension_semantics = [#tpu.dimension_semantics<parallel>, #tpu.dimension_semantics<parallel>, #tpu.dimension_semantics<arbitrary>], iteration_bounds = array<i64: 1, 1, 1>, scalar_prefetch = 0 : i64, scratch_operands = 1 : i64, tpu.core_type = #tpu.core_type<tc>, window_params = [{transform_indices = @transform_0, window_bounds = array<i64: 16, 64>}, {transform_indices = @transform_1, window_bounds = array<i64: 64, 32>}, {transform_indices = @transform_2, window_bounds = array<i64: 1, 32>}, {transform_indices = @transform_3, window_bounds = array<i64: 16, 32>}, {transform_indices = @transform_4, window_bounds = array<i64: 16, 32>}]} {
    %c0_i32 = arith.constant 0 : i32
    %0 = arith.cmpi eq, %arg2, %c0_i32 : i32
    %1 = arith.extui %0 : i1 to i32
    %c0_i32_0 = arith.constant 0 : i32
    %2 = arith.cmpi ne, %1, %c0_i32_0 : i32
    scf.if %2 {
      %cst_10 = arith.constant 0.000000e+00 : f32
      %12 = vector.broadcast %cst_10 : f32 to vector<16x32xf32>
      %c0_11 = arith.constant 0 : index
      %c0_12 = arith.constant 0 : index
      %13 = vector.load %arg8[%c0_11, %c0_12] : memref<16x32xf32, #tpu.memory_space<vmem>>, vector<16x32xf32>
      tpu.vector_store %arg8[%c0_11, %c0_12], %12 {strides = array<i32>} : memref<16x32xf32, #tpu.memory_space<vmem>>, vector<16x32xf32>,
    } else {
    }
    %c0 = arith.constant 0 : index
    %c0_1 = arith.constant 0 : index
    %3 = vector.load %arg8[%c0, %c0_1] : memref<16x32xf32, #tpu.memory_space<vmem>>, vector<16x32xf32>
    %c0_2 = arith.constant 0 : index
    %c0_3 = arith.constant 0 : index
    %4 = vector.load %arg3[%c0_2, %c0_3] : memref<16x64xbf16, #tpu.memory_space<vmem>>, vector<16x64xbf16>
    %c0_4 = arith.constant 0 : index
    %c0_5 = arith.constant 0 : index
    %5 = vector.load %arg4[%c0_4, %c0_5] : memref<64x32xbf16, #tpu.memory_space<vmem>>, vector<64x32xbf16>
    %cst = arith.constant dense<0.000000e+00> : vector<16x32xf32>
    %6 = tpu.matmul %4, %5, %cst {dimension_numbers = #tpu.dot_dimension_numbers<[1], [0], [0], [1], [0, 0, 1, 1], [], []>} : vector<16x64xbf16>, vector<64x32xbf16>, vector<16x32xf32> -> vector<16x32xf32>
    %7 = arith.addf %3, %6 : vector<16x32xf32>
    %c0_6 = arith.constant 0 : index
    %c0_7 = arith.constant 0 : index
    %8 = vector.load %arg8[%c0_6, %c0_7] : memref<16x32xf32, #tpu.memory_space<vmem>>, vector<16x32xf32>
    tpu.vector_store %arg8[%c0_6, %c0_7], %7 {strides = array<i32>} : memref<16x32xf32, #tpu.memory_space<vmem>>, vector<16x32xf32>,
    %c0_i32_8 = arith.constant 0 : i32
    %9 = arith.cmpi eq, %arg2, %c0_i32_8 : i32
    %10 = arith.extui %9 : i1 to i32
    %c0_i32_9 = arith.constant 0 : i32
    %11 = arith.cmpi ne, %10, %c0_i32_9 : i32
    scf.if %11 {
      %c0_10 = arith.constant 0 : index
      %c0_11 = arith.constant 0 : index
      %12 = vector.load %arg8[%c0_10, %c0_11] : memref<16x32xf32, #tpu.memory_space<vmem>>, vector<16x32xf32>
      %c0_12 = arith.constant 0 : index
      %c0_13 = arith.constant 0 : index
      %13 = vector.load %arg5[%c0_12, %c0_13] : memref<1x32xf32, #tpu.memory_space<vmem>>, vector<1x32xf32>
      %14 = vector.broadcast %13 : vector<1x32xf32> to vector<16x32xf32>
      %15 = arith.addf %12, %14 : vector<16x32xf32>
      %c0_14 = arith.constant 0 : index
      %c0_15 = arith.constant 0 : index
      %16 = vector.load %arg6[%c0_14, %c0_15] : memref<16x32xbf16, #tpu.memory_space<vmem>>, vector<16x32xbf16>
      %17 = arith.extf %16 : vector<16x32xbf16> to vector<16x32xf32>
      %18 = arith.addf %15, %17 : vector<16x32xf32>
      %19 = arith.truncf %18 : vector<16x32xf32> to vector<16x32xbf16>
      %c0_16 = arith.constant 0 : index
      %c0_17 = arith.constant 0 : index
      %20 = vector.load %arg7[%c0_16, %c0_17] : memref<16x32xbf16, #tpu.memory_space<vmem>>, vector<16x32xbf16>
      tpu.vector_store %arg7[%c0_16, %c0_17], %19 {strides = array<i32>} : memref<16x32xbf16, #tpu.memory_space<vmem>>, vector<16x32xbf16>,
    } else {
    }
    return
  }
  func.func @transform_0(%arg0: i32, %arg1: i32, %arg2: i32) -> (i32, i32) {
    %c0_i32 = arith.constant 0 : i32
    return %arg0, %arg2 : i32, i32
  }
  func.func @transform_1(%arg0: i32, %arg1: i32, %arg2: i32) -> (i32, i32) {
    %c0_i32 = arith.constant 0 : i32
    return %arg2, %arg1 : i32, i32
  }
  func.func @transform_2(%arg0: i32, %arg1: i32, %arg2: i32) -> (i32, i32) {
    %c0_i32 = arith.constant 0 : i32
    %c0_i32_0 = arith.constant 0 : i32
    return %c0_i32, %arg1 : i32, i32
  }
  func.func @transform_3(%arg0: i32, %arg1: i32, %arg2: i32) -> (i32, i32) {
    %c0_i32 = arith.constant 0 : i32
    return %arg0, %arg1 : i32, i32
  }
  func.func @transform_4(%arg0: i32, %arg1: i32, %arg2: i32) -> (i32, i32) {
    %c0_i32 = arith.constant 0 : i32
    return %arg0, %arg1 : i32, i32
  }
}

module attributes {stable_mosaic.version = 11 : i64} {
  func.func @_ln_matmul_kernel(%arg0: i32, %arg1: i32, %arg2: memref<16x32xbf16, #tpu.memory_space<vmem>>, %arg3: memref<32x32xbf16, #tpu.memory_space<vmem>>, %arg4: memref<1x32xf32, #tpu.memory_space<vmem>>, %arg5: memref<1x32xf32, #tpu.memory_space<vmem>>, %arg6: memref<1x32xf32, #tpu.memory_space<vmem>>, %arg7: memref<16x32xbf16, #tpu.memory_space<vmem>>, %arg8: memref<16x32xbf16, #tpu.memory_space<vmem>>) attributes {dimension_semantics = [#tpu.dimension_semantics<parallel>, #tpu.dimension_semantics<arbitrary>], iteration_bounds = array<i64: 1, 1>, scalar_prefetch = 0 : i64, scratch_operands = 1 : i64, tpu.core_type = #tpu.core_type<tc>, window_params = [{transform_indices = @transform_0, window_bounds = array<i64: 16, 32>}, {transform_indices = @transform_1, window_bounds = array<i64: 32, 32>}, {transform_indices = @transform_2, window_bounds = array<i64: 1, 32>}, {pipeline_mode = #tpu.pipeline_mode<synchronous>, transform_indices = @transform_3, window_bounds = array<i64: 1, 32>}, {pipeline_mode = #tpu.pipeline_mode<synchronous>, transform_indices = @transform_4, window_bounds = array<i64: 1, 32>}, {transform_indices = @transform_5, window_bounds = array<i64: 16, 32>}]} {
    %c0_i32 = arith.constant 0 : i32
    %0 = arith.cmpi eq, %arg1, %c0_i32 : i32
    %1 = arith.extui %0 : i1 to i32
    %c0_i32_0 = arith.constant 0 : i32
    %2 = arith.cmpi ne, %1, %c0_i32_0 : i32
    scf.if %2 {
      %c0_11 = arith.constant 0 : index
      %c0_12 = arith.constant 0 : index
      %19 = vector.load %arg2[%c0_11, %c0_12] : memref<16x32xbf16, #tpu.memory_space<vmem>>, vector<16x32xbf16>
      %20 = arith.extf %19 : vector<16x32xbf16> to vector<16x32xf32>
      %cst_13 = arith.constant dense<0.000000e+00> : vector<16xf32>
      %21 = vector.multi_reduction <add>, %20, %cst_13 [1] : vector<16x32xf32> to vector<16xf32>
      %22 = vector.shape_cast %21 : vector<16xf32> to vector<16x1xf32>
      %cst_14 = arith.constant 3.200000e+01 : f32
      %23 = vector.broadcast %cst_14 : f32 to vector<16x1xf32>
      %24 = arith.divf %22, %23 : vector<16x1xf32>
      %25 = vector.broadcast %24 : vector<16x1xf32> to vector<16x32xf32>
      %26 = arith.subf %20, %25 : vector<16x32xf32>
      %27 = arith.mulf %26, %26 : vector<16x32xf32>
      %cst_15 = arith.constant dense<0.000000e+00> : vector<16xf32>
      %28 = vector.multi_reduction <add>, %27, %cst_15 [1] : vector<16x32xf32> to vector<16xf32>
      %29 = vector.shape_cast %28 : vector<16xf32> to vector<16x1xf32>
      %cst_16 = arith.constant 3.200000e+01 : f32
      %30 = vector.broadcast %cst_16 : f32 to vector<16x1xf32>
      %31 = arith.divf %29, %30 : vector<16x1xf32>
      %32 = vector.broadcast %24 : vector<16x1xf32> to vector<16x32xf32>
      %33 = arith.subf %20, %32 : vector<16x32xf32>
      %cst_17 = arith.constant 9.99999996E-13 : f32
      %34 = vector.broadcast %cst_17 : f32 to vector<16x1xf32>
      %35 = arith.addf %31, %34 : vector<16x1xf32>
      %36 = math.rsqrt %35 : vector<16x1xf32>
      %37 = vector.broadcast %36 : vector<16x1xf32> to vector<16x32xf32>
      %38 = arith.mulf %33, %37 : vector<16x32xf32>
      %c0_18 = arith.constant 0 : index
      %c0_19 = arith.constant 0 : index
      %39 = vector.load %arg5[%c0_18, %c0_19] : memref<1x32xf32, #tpu.memory_space<vmem>>, vector<1x32xf32>
      %40 = vector.broadcast %39 : vector<1x32xf32> to vector<16x32xf32>
      %41 = arith.mulf %38, %40 : vector<16x32xf32>
      %c0_20 = arith.constant 0 : index
      %c0_21 = arith.constant 0 : index
      %42 = vector.load %arg6[%c0_20, %c0_21] : memref<1x32xf32, #tpu.memory_space<vmem>>, vector<1x32xf32>
      %43 = vector.broadcast %42 : vector<1x32xf32> to vector<16x32xf32>
      %44 = arith.addf %41, %43 : vector<16x32xf32>
      %45 = arith.truncf %44 : vector<16x32xf32> to vector<16x32xbf16>
      %c0_22 = arith.constant 0 : index
      %c0_23 = arith.constant 0 : index
      %46 = vector.load %arg8[%c0_22, %c0_23] : memref<16x32xbf16, #tpu.memory_space<vmem>>, vector<16x32xbf16>
      tpu.vector_store %arg8[%c0_22, %c0_23], %45 {strides = array<i32>} : memref<16x32xbf16, #tpu.memory_space<vmem>>, vector<16x32xbf16>,
    } else {
    }
    %c0 = arith.constant 0 : index
    %c0_1 = arith.constant 0 : index
    %3 = vector.load %arg8[%c0, %c0_1] : memref<16x32xbf16, #tpu.memory_space<vmem>>, vector<16x32xbf16>
    %c0_2 = arith.constant 0 : index
    %c0_3 = arith.constant 0 : index
    %4 = vector.load %arg3[%c0_2, %c0_3] : memref<32x32xbf16, #tpu.memory_space<vmem>>, vector<32x32xbf16>
    %cst = arith.constant dense<0.000000e+00> : vector<16x32xf32>
    %5 = tpu.matmul %3, %4, %cst {dimension_numbers = #tpu.dot_dimension_numbers<[1], [0], [0], [1], [0, 0, 1, 1], [], []>} : vector<16x32xbf16>, vector<32x32xbf16>, vector<16x32xf32> -> vector<16x32xf32>
    %c0_4 = arith.constant 0 : index
    %c0_5 = arith.constant 0 : index
    %6 = vector.load %arg4[%c0_4, %c0_5] : memref<1x32xf32, #tpu.memory_space<vmem>>, vector<1x32xf32>
    %7 = vector.broadcast %6 : vector<1x32xf32> to vector<16x32xf32>
    %8 = arith.addf %5, %7 : vector<16x32xf32>
    %cst_6 = arith.constant 5.000000e-01 : f32
    %9 = vector.broadcast %cst_6 : f32 to vector<16x32xf32>
    %10 = arith.mulf %8, %9 : vector<16x32xf32>
    %cst_7 = arith.constant 1.41421354 : f32
    %11 = vector.broadcast %cst_7 : f32 to vector<16x32xf32>
    %12 = arith.divf %8, %11 : vector<16x32xf32>
    %13 = math.erf %12 : vector<16x32xf32>
    %cst_8 = arith.constant 1.000000e+00 : f32
    %14 = vector.broadcast %cst_8 : f32 to vector<16x32xf32>
    %15 = arith.addf %14, %13 : vector<16x32xf32>
    %16 = arith.mulf %10, %15 : vector<16x32xf32>
    %17 = arith.truncf %16 : vector<16x32xf32> to vector<16x32xbf16>
    %c0_9 = arith.constant 0 : index
    %c0_10 = arith.constant 0 : index
    %18 = vector.load %arg7[%c0_9, %c0_10] : memref<16x32xbf16, #tpu.memory_space<vmem>>, vector<16x32xbf16>
    tpu.vector_store %arg7[%c0_9, %c0_10], %17 {strides = array<i32>} : memref<16x32xbf16, #tpu.memory_space<vmem>>, vector<16x32xbf16>,
    return
  }
  func.func @transform_0(%arg0: i32, %arg1: i32) -> (i32, i32) {
    %c0_i32 = arith.constant 0 : i32
    %c0_i32_0 = arith.constant 0 : i32
    return %arg0, %c0_i32 : i32, i32
  }
  func.func @transform_1(%arg0: i32, %arg1: i32) -> (i32, i32) {
    %c0_i32 = arith.constant 0 : i32
    %c0_i32_0 = arith.constant 0 : i32
    return %c0_i32, %arg1 : i32, i32
  }
  func.func @transform_2(%arg0: i32, %arg1: i32) -> (i32, i32) {
    %c0_i32 = arith.constant 0 : i32
    %c0_i32_0 = arith.constant 0 : i32
    return %c0_i32, %arg1 : i32, i32
  }
  func.func @transform_3(%arg0: i32, %arg1: i32) -> (i32, i32) {
    %c0_i32 = arith.constant 0 : i32
    %c0_i32_0 = arith.constant 0 : i32
    %c0_i32_1 = arith.constant 0 : i32
    return %c0_i32, %c0_i32_0 : i32, i32
  }
  func.func @transform_4(%arg0: i32, %arg1: i32) -> (i32, i32) {
    %c0_i32 = arith.constant 0 : i32
    %c0_i32_0 = arith.constant 0 : i32
    %c0_i32_1 = arith.constant 0 : i32
    return %c0_i32, %c0_i32_0 : i32, i32
  }
  func.func @transform_5(%arg0: i32, %arg1: i32) -> (i32, i32) {
    %c0_i32 = arith.constant 0 : i32
    return %arg0, %arg1 : i32, i32
  }
}

module attributes {stable_mosaic.version = 11 : i64} {
  func.func @_ln_matmul_kernel(%arg0: i32, %arg1: i32, %arg2: memref<16x32xbf16, #tpu.memory_space<vmem>>, %arg3: memref<32x128xbf16, #tpu.memory_space<vmem>>, %arg4: memref<1x128xf32, #tpu.memory_space<vmem>>, %arg5: memref<1x32xf32, #tpu.memory_space<vmem>>, %arg6: memref<1x32xf32, #tpu.memory_space<vmem>>, %arg7: memref<16x128xf32, #tpu.memory_space<vmem>>, %arg8: memref<16x32xbf16, #tpu.memory_space<vmem>>) attributes {dimension_semantics = [#tpu.dimension_semantics<parallel>, #tpu.dimension_semantics<arbitrary>], iteration_bounds = array<i64: 1, 1>, scalar_prefetch = 0 : i64, scratch_operands = 1 : i64, tpu.core_type = #tpu.core_type<tc>, window_params = [{transform_indices = @transform_0, window_bounds = array<i64: 16, 32>}, {transform_indices = @transform_1, window_bounds = array<i64: 32, 128>}, {transform_indices = @transform_2, window_bounds = array<i64: 1, 128>}, {pipeline_mode = #tpu.pipeline_mode<synchronous>, transform_indices = @transform_3, window_bounds = array<i64: 1, 32>}, {pipeline_mode = #tpu.pipeline_mode<synchronous>, transform_indices = @transform_4, window_bounds = array<i64: 1, 32>}, {transform_indices = @transform_5, window_bounds = array<i64: 16, 128>}]} {
    %c0_i32 = arith.constant 0 : i32
    %0 = arith.cmpi eq, %arg1, %c0_i32 : i32
    %1 = arith.extui %0 : i1 to i32
    %c0_i32_0 = arith.constant 0 : i32
    %2 = arith.cmpi ne, %1, %c0_i32_0 : i32
    scf.if %2 {
      %c0_8 = arith.constant 0 : index
      %c0_9 = arith.constant 0 : index
      %10 = vector.load %arg2[%c0_8, %c0_9] : memref<16x32xbf16, #tpu.memory_space<vmem>>, vector<16x32xbf16>
      %11 = arith.extf %10 : vector<16x32xbf16> to vector<16x32xf32>
      %cst_10 = arith.constant dense<0.000000e+00> : vector<16xf32>
      %12 = vector.multi_reduction <add>, %11, %cst_10 [1] : vector<16x32xf32> to vector<16xf32>
      %13 = vector.shape_cast %12 : vector<16xf32> to vector<16x1xf32>
      %cst_11 = arith.constant 3.200000e+01 : f32
      %14 = vector.broadcast %cst_11 : f32 to vector<16x1xf32>
      %15 = arith.divf %13, %14 : vector<16x1xf32>
      %16 = vector.broadcast %15 : vector<16x1xf32> to vector<16x32xf32>
      %17 = arith.subf %11, %16 : vector<16x32xf32>
      %18 = arith.mulf %17, %17 : vector<16x32xf32>
      %cst_12 = arith.constant dense<0.000000e+00> : vector<16xf32>
      %19 = vector.multi_reduction <add>, %18, %cst_12 [1] : vector<16x32xf32> to vector<16xf32>
      %20 = vector.shape_cast %19 : vector<16xf32> to vector<16x1xf32>
      %cst_13 = arith.constant 3.200000e+01 : f32
      %21 = vector.broadcast %cst_13 : f32 to vector<16x1xf32>
      %22 = arith.divf %20, %21 : vector<16x1xf32>
      %23 = vector.broadcast %15 : vector<16x1xf32> to vector<16x32xf32>
      %24 = arith.subf %11, %23 : vector<16x32xf32>
      %cst_14 = arith.constant 9.99999996E-13 : f32
      %25 = vector.broadcast %cst_14 : f32 to vector<16x1xf32>
      %26 = arith.addf %22, %25 : vector<16x1xf32>
      %27 = math.rsqrt %26 : vector<16x1xf32>
      %28 = vector.broadcast %27 : vector<16x1xf32> to vector<16x32xf32>
      %29 = arith.mulf %24, %28 : vector<16x32xf32>
      %c0_15 = arith.constant 0 : index
      %c0_16 = arith.constant 0 : index
      %30 = vector.load %arg5[%c0_15, %c0_16] : memref<1x32xf32, #tpu.memory_space<vmem>>, vector<1x32xf32>
      %31 = vector.broadcast %30 : vector<1x32xf32> to vector<16x32xf32>
      %32 = arith.mulf %29, %31 : vector<16x32xf32>
      %c0_17 = arith.constant 0 : index
      %c0_18 = arith.constant 0 : index
      %33 = vector.load %arg6[%c0_17, %c0_18] : memref<1x32xf32, #tpu.memory_space<vmem>>, vector<1x32xf32>
      %34 = vector.broadcast %33 : vector<1x32xf32> to vector<16x32xf32>
      %35 = arith.addf %32, %34 : vector<16x32xf32>
      %36 = arith.truncf %35 : vector<16x32xf32> to vector<16x32xbf16>
      %c0_19 = arith.constant 0 : index
      %c0_20 = arith.constant 0 : index
      %37 = vector.load %arg8[%c0_19, %c0_20] : memref<16x32xbf16, #tpu.memory_space<vmem>>, vector<16x32xbf16>
      tpu.vector_store %arg8[%c0_19, %c0_20], %36 {strides = array<i32>} : memref<16x32xbf16, #tpu.memory_space<vmem>>, vector<16x32xbf16>,
    } else {
    }
    %c0 = arith.constant 0 : index
    %c0_1 = arith.constant 0 : index
    %3 = vector.load %arg8[%c0, %c0_1] : memref<16x32xbf16, #tpu.memory_space<vmem>>, vector<16x32xbf16>
    %c0_2 = arith.constant 0 : index
    %c0_3 = arith.constant 0 : index
    %4 = vector.load %arg3[%c0_2, %c0_3] : memref<32x128xbf16, #tpu.memory_space<vmem>>, vector<32x128xbf16>
    %cst = arith.constant dense<0.000000e+00> : vector<16x128xf32>
    %5 = tpu.matmul %3, %4, %cst {dimension_numbers = #tpu.dot_dimension_numbers<[1], [0], [0], [1], [0, 0, 1, 1], [], []>} : vector<16x32xbf16>, vector<32x128xbf16>, vector<16x128xf32> -> vector<16x128xf32>
    %c0_4 = arith.constant 0 : index
    %c0_5 = arith.constant 0 : index
    %6 = vector.load %arg4[%c0_4, %c0_5] : memref<1x128xf32, #tpu.memory_space<vmem>>, vector<1x128xf32>
    %7 = vector.broadcast %6 : vector<1x128xf32> to vector<16x128xf32>
    %8 = arith.addf %5, %7 : vector<16x128xf32>
    %c0_6 = arith.constant 0 : index
    %c0_7 = arith.constant 0 : index
    %9 = vector.load %arg7[%c0_6, %c0_7] : memref<16x128xf32, #tpu.memory_space<vmem>>, vector<16x128xf32>
    tpu.vector_store %arg7[%c0_6, %c0_7], %8 {strides = array<i32>} : memref<16x128xf32, #tpu.memory_space<vmem>>, vector<16x128xf32>,
    return
  }
  func.func @transform_0(%arg0: i32, %arg1: i32) -> (i32, i32) {
    %c0_i32 = arith.constant 0 : i32
    %c0_i32_0 = arith.constant 0 : i32
    return %arg0, %c0_i32 : i32, i32
  }
  func.func @transform_1(%arg0: i32, %arg1: i32) -> (i32, i32) {
    %c0_i32 = arith.constant 0 : i32
    %c0_i32_0 = arith.constant 0 : i32
    return %c0_i32, %arg1 : i32, i32
  }
  func.func @transform_2(%arg0: i32, %arg1: i32) -> (i32, i32) {
    %c0_i32 = arith.constant 0 : i32
    %c0_i32_0 = arith.constant 0 : i32
    return %c0_i32, %arg1 : i32, i32
  }
  func.func @transform_3(%arg0: i32, %arg1: i32) -> (i32, i32) {
    %c0_i32 = arith.constant 0 : i32
    %c0_i32_0 = arith.constant 0 : i32
    %c0_i32_1 = arith.constant 0 : i32
    return %c0_i32, %c0_i32_0 : i32, i32
  }
  func.func @transform_4(%arg0: i32, %arg1: i32) -> (i32, i32) {
    %c0_i32 = arith.constant 0 : i32
    %c0_i32_0 = arith.constant 0 : i32
    %c0_i32_1 = arith.constant 0 : i32
    return %c0_i32, %c0_i32_0 : i32, i32
  }
  func.func @transform_5(%arg0: i32, %arg1: i32) -> (i32, i32) {
    %c0_i32 = arith.constant 0 : i32
    return %arg0, %arg1 : i32, i32
  }
}

module attributes {stable_mosaic.version = 11 : i64} {
  func.func @_layernorm_kernel(%arg0: i32, %arg1: memref<16x32xbf16, #tpu.memory_space<vmem>>, %arg2: memref<1x32xf32, #tpu.memory_space<vmem>>, %arg3: memref<1x32xf32, #tpu.memory_space<vmem>>, %arg4: memref<16x32xbf16, #tpu.memory_space<vmem>>) attributes {dimension_semantics = [#tpu.dimension_semantics<parallel>], iteration_bounds = array<i64: 1>, scalar_prefetch = 0 : i64, scratch_operands = 0 : i64, tpu.core_type = #tpu.core_type<tc>, window_params = [{transform_indices = @transform_0, window_bounds = array<i64: 16, 32>}, {pipeline_mode = #tpu.pipeline_mode<synchronous>, transform_indices = @transform_1, window_bounds = array<i64: 1, 32>}, {pipeline_mode = #tpu.pipeline_mode<synchronous>, transform_indices = @transform_2, window_bounds = array<i64: 1, 32>}, {transform_indices = @transform_3, window_bounds = array<i64: 16, 32>}]} {
    %c0 = arith.constant 0 : index
    %c0_0 = arith.constant 0 : index
    %0 = vector.load %arg1[%c0, %c0_0] : memref<16x32xbf16, #tpu.memory_space<vmem>>, vector<16x32xbf16>
    %1 = arith.extf %0 : vector<16x32xbf16> to vector<16x32xf32>
    %cst = arith.constant dense<0.000000e+00> : vector<16xf32>
    %2 = vector.multi_reduction <add>, %1, %cst [1] : vector<16x32xf32> to vector<16xf32>
    %3 = vector.shape_cast %2 : vector<16xf32> to vector<16x1xf32>
    %cst_1 = arith.constant 3.200000e+01 : f32
    %4 = vector.broadcast %cst_1 : f32 to vector<16x1xf32>
    %5 = arith.divf %3, %4 : vector<16x1xf32>
    %6 = vector.broadcast %5 : vector<16x1xf32> to vector<16x32xf32>
    %7 = arith.subf %1, %6 : vector<16x32xf32>
    %8 = arith.mulf %7, %7 : vector<16x32xf32>
    %cst_2 = arith.constant dense<0.000000e+00> : vector<16xf32>
    %9 = vector.multi_reduction <add>, %8, %cst_2 [1] : vector<16x32xf32> to vector<16xf32>
    %10 = vector.shape_cast %9 : vector<16xf32> to vector<16x1xf32>
    %cst_3 = arith.constant 3.200000e+01 : f32
    %11 = vector.broadcast %cst_3 : f32 to vector<16x1xf32>
    %12 = arith.divf %10, %11 : vector<16x1xf32>
    %13 = vector.broadcast %5 : vector<16x1xf32> to vector<16x32xf32>
    %14 = arith.subf %1, %13 : vector<16x32xf32>
    %cst_4 = arith.constant 9.99999996E-13 : f32
    %15 = vector.broadcast %cst_4 : f32 to vector<16x1xf32>
    %16 = arith.addf %12, %15 : vector<16x1xf32>
    %17 = math.rsqrt %16 : vector<16x1xf32>
    %18 = vector.broadcast %17 : vector<16x1xf32> to vector<16x32xf32>
    %19 = arith.mulf %14, %18 : vector<16x32xf32>
    %c0_5 = arith.constant 0 : index
    %c0_6 = arith.constant 0 : index
    %20 = vector.load %arg2[%c0_5, %c0_6] : memref<1x32xf32, #tpu.memory_space<vmem>>, vector<1x32xf32>
    %21 = vector.broadcast %20 : vector<1x32xf32> to vector<16x32xf32>
    %22 = arith.mulf %19, %21 : vector<16x32xf32>
    %c0_7 = arith.constant 0 : index
    %c0_8 = arith.constant 0 : index
    %23 = vector.load %arg3[%c0_7, %c0_8] : memref<1x32xf32, #tpu.memory_space<vmem>>, vector<1x32xf32>
    %24 = vector.broadcast %23 : vector<1x32xf32> to vector<16x32xf32>
    %25 = arith.addf %22, %24 : vector<16x32xf32>
    %26 = arith.truncf %25 : vector<16x32xf32> to vector<16x32xbf16>
    %c0_9 = arith.constant 0 : index
    %c0_10 = arith.constant 0 : index
    %27 = vector.load %arg4[%c0_9, %c0_10] : memref<16x32xbf16, #tpu.memory_space<vmem>>, vector<16x32xbf16>
    tpu.vector_store %arg4[%c0_9, %c0_10], %26 {strides = array<i32>} : memref<16x32xbf16, #tpu.memory_space<vmem>>, vector<16x32xbf16>,
    return
  }
  func.func @transform_0(%arg0: i32) -> (i32, i32) {
    %c0_i32 = arith.constant 0 : i32
    %c0_i32_0 = arith.constant 0 : i32
    return %arg0, %c0_i32 : i32, i32
  }
  func.func @transform_1(%arg0: i32) -> (i32, i32) {
    %c0_i32 = arith.constant 0 : i32
    %c0_i32_0 = arith.constant 0 : i32
    %c0_i32_1 = arith.constant 0 : i32
    return %c0_i32, %c0_i32_0 : i32, i32
  }
  func.func @transform_2(%arg0: i32) -> (i32, i32) {
    %c0_i32 = arith.constant 0 : i32
    %c0_i32_0 = arith.constant 0 : i32
    %c0_i32_1 = arith.constant 0 : i32
    return %c0_i32, %c0_i32_0 : i32, i32
  }
  func.func @transform_3(%arg0: i32) -> (i32, i32) {
    %c0_i32 = arith.constant 0 : i32
    %c0_i32_0 = arith.constant 0 : i32
    return %arg0, %c0_i32 : i32, i32
  }
}

</mosaic_0001>

<bundles_post_ra>
// kernel: _lambda_.13
= control target key start
LH: loop header
LB: loop body
LE: loop exit
PB: predicated region body
PF: predicated region fallthrough
CT: control target
= control target key end

     0   :  { %vm29_vm0 = vcmask 261120   ;;  %v182_v5 = vmov 32.0   ;;  %vm95_vm6 = vcmask 257024   ;;  %vm145_vm9 = vcmask 781312   ;;  %s242_s0 = inlined_call_operand.vmem [shape: bf16[16,32], index: 0, kind: input, shape index: {}]   ;;  %s243_s3 = inlined_call_operand.vmem [shape: f32[1,32], index: 3, kind: input, shape index: {}]   ;;  %s244_s4 = inlined_call_operand.vmem [shape: f32[1,32], index: 4, kind: input, shape index: {}]   ;;  %s245_s2 = inlined_call_operand.vmem [shape: f32[1,96], index: 2, kind: input, shape index: {}]   ;;  %s246_s1 = inlined_call_operand.vmem [shape: bf16[32,96], index: 1, kind: input, shape index: {}]   ;;  %s247_s5 = inlined_call_operand.vmem [shape: bf16[16,96], index: 5, kind: output, shape index: {}]  }
   0x1   :  { %v169_v0 = vld [vmem:[%s242_s0] sm:$0xff]   ;;  %176 = vrcp.f32 %v182_v5  ;;  %v167_v25 = vld [vmem:[%s246_s1 + $0x8] sm:$0xff] }
   0x2   :  { %v170_v1 = vunpack.c.l.bf16 %v169_v0  ;;  %v171_v3 = vunpack.c.h.bf16 %v169_v0  ;;  %135 = vmatpush.bf16.msra.mxu0 %v167_v25  ;;  %v166_v28 = vld [vmem:[%s246_s1] sm:$0xff] }
   0x3   :  { %v173_v38 = vld [vmem:[%s243_s3] ss:$0 sm:$0xff] }
   0x4   :  { %v30_v2 = vsel %vm29_vm0, %v170_v1, 0.0  ;;  %v33_v4 = vsel %vm29_vm0, %v171_v3, 0.0  ;;  %v174_v41 = vld [vmem:[%s244_s4] ss:$0 sm:$0xff] }
   0x5   :  { %31 = vadd.xlane.f32.xlu0 %v30_v2  ;;  %v175_v55 = vld [vmem:[%s245_s2] ss:$0 sm:$0xff] }
   0x6   :  { %136 = vmatpush.bf16.msra.mxu0 %v166_v28 }
   0x7   :  { %v177_v6 = vpop.eup %176 }
   0x8   :  { %v37_v7 = vmul.f32 32.0, %v177_v6  ;;  %vm41_vm1 = vweird.f32 %v177_v6 }
   0xa   :  { %v38_v8 = vsub.f32 1.0, %v37_v7 }
   0xc   :  { %v39_v9 = vmul.f32 %v177_v6, %v38_v8 }
   0xd   :  { %34 = vadd.xlane.f32.xlu0 %v33_v4 }
   0xe   :  { %v40_v10 = vadd.f32 %v177_v6, %v39_v9 }
  0x10   :  { %v42_v11 = vsel %vm41_vm1, %v177_v6, %v40_v10 }
  0x78   :  { %v32_v12 = vpop.xlane.xlu0 %31 }
  0x79   :  { %v43_v13 = vmul.f32 %v42_v11, %v32_v12 }
  0x7b   :  { %v45_v14 = vsub.f32 %v170_v1, %v43_v13 }
  0x7d   :  { %v47_v15 = vmul.f32 %v45_v14, %v45_v14 }
  0x7f   :  { %v49_v16 = vsel %vm29_vm0, %v47_v15, 0.0 }
  0x80   :  { %50 = vadd.xlane.f32.xlu1 %v49_v16  ;;  %v35_v17 = vpop.xlane.xlu0 %34 }
  0x81   :  { %v44_v18 = vmul.f32 %v42_v11, %v35_v17 }
  0x83   :  { %v46_v19 = vsub.f32 %v171_v3, %v44_v18 }
  0x85   :  { %v48_v20 = vmul.f32 %v46_v19, %v46_v19 }
  0x87   :  { %v52_v21 = vsel %vm29_vm0, %v48_v20, 0.0 }
  0x88   :  { %53 = vadd.xlane.f32.xlu1 %v52_v21 }
  0xf3   :  { %v51_v22 = vpop.xlane.xlu1 %50 }
  0xf4   :  { %v55_v23 = vmul.f32 %v51_v22, %v42_v11 }
  0xf6   :  { %v57_v24 = vadd.f32 1e-12, %v55_v23 }
  0xf8   :  { %178 = vrsqrt.f32 %v57_v24  ;;  %vm65_vm3 = vweird.f32 %v57_v24 }
  0xfb   :  { %v54_v26 = vpop.xlane.xlu1 %53 }
  0xfc   :  { %v56_v27 = vmul.f32 %v54_v26, %v42_v11 }
  0xfe   :  { %v179_v29 = vpop.eup %178  ;;  %v58_v30 = vadd.f32 1e-12, %v56_v27 }
  0xff   :  { %v60_v31 = vmul.f32 %v179_v29, %v57_v24  ;;  %vm66_vm2 = vweird.f32 %v179_v29 }
 0x100   :  { %180 = vrsqrt.f32 %v58_v30  ;;  %vm67_vm4 = vmor %vm65_vm3, %vm66_vm2  ;;  %vm75_vm7 = vweird.f32 %v58_v30 }
 0x101   :  { %v61_v32 = vmul.f32 %v179_v29, %v60_v31 }
 0x103   :  { %v62_v33 = vmul.f32 0.5, %v61_v32 }
 0x105   :  { %v63_v34 = vsub.f32 1.5, %v62_v33 }
 0x106   :  { %v181_v35 = vpop.eup %180 }
 0x107   :  { %v64_v36 = vmul.f32 %v179_v29, %v63_v34  ;;  %v70_v37 = vmul.f32 %v181_v35, %v58_v30  ;;  %vm76_vm5 = vweird.f32 %v181_v35 }
 0x108   :  { %vm77_vm8 = vmor %vm75_vm7, %vm76_vm5 }
 0x109   :  { %v68_v39 = vsel %vm67_vm4, %v179_v29, %v64_v36  ;;  %v71_v40 = vmul.f32 %v181_v35, %v70_v37 }
 0x10a   :  { %v79_v42 = vmul.f32 %v68_v39, %v45_v14 }
 0x10b   :  { %v72_v43 = vmul.f32 0.5, %v71_v40 }
 0x10c   :  { %v85_v44 = vmul.f32 %v173_v38, %v79_v42 }
 0x10d   :  { %v73_v45 = vsub.f32 1.5, %v72_v43 }
 0x10e   :  { %v91_v46 = vadd.f32 %v174_v41, %v85_v44 }
 0x10f   :  { %v74_v47 = vmul.f32 %v181_v35, %v73_v45 }
 0x110   :  { %v93_v48 = vpack.c.bf16 %v91_v46, %v91_v46 }
 0x111   :  { %v78_v49 = vsel %vm77_vm8, %v181_v35, %v74_v47 }
 0x112   :  { %96 = vst.msk [vmem:[#allocation2] sm:$0xf] %vm95_vm6, %v93_v48  ;;  %v80_v50 = vmul.f32 %v78_v49, %v46_v19 }
 0x114   :  { %v86_v51 = vmul.f32 %v173_v38, %v80_v50 }
 0x116   :  { %v92_v52 = vadd.f32 %v174_v41, %v86_v51 }
 0x118   :  { %v94_v53 = vpack.c.bf16 %v92_v52, %v92_v52 }
 0x11a   :  { %97 = vst.msk [vmem:[#allocation2 + $0x4] sm:$0xf] %vm95_vm6, %v94_v53 }
 0x121   :  { %v165_v54 = vld [vmem:[#allocation2] sm:$0xff] }
 0x122   :  { %164 = vmatmul.msk.bf16.vlgmr.msra.gmra.mxu0 %vm29_vm0, %v165_v54 }
 0x19f   :  { %v138_v56 = vpop.f32.mrf.mxu0 }
 0x1a0   :  { %v139_v57 = vadd.f32 %v175_v55, %v138_v56 }
 0x1a2   :  { %v143_v58 = vpack.c.bf16 %v139_v57, %v139_v57 }
 0x1a4   :  { %146 = vst.msk [vmem:[%s247_s5] sm:$0xf] %vm145_vm9, %v143_v58 }
 0x1a7   :  { %v140_v59 = vpop.f32.mrf.mxu0 }
 0x1a8   :  { %v141_v60 = vadd.f32 %v175_v55, %v140_v59 }
 0x1aa   :  { %v144_v61 = vpack.c.bf16 %v141_v60, %v141_v60 }
 0x1ac   :  { %147 = vst.msk [vmem:[%s247_s5 + $0x4] sm:$0xf] %vm145_vm9, %v144_v61 }

// kernel: _lambda_.16
= control target key start
LH: loop header
LB: loop body
LE: loop exit
PB: predicated region body
PF: predicated region fallthrough
CT: control target
= control target key end

     0   :  { %vm29_vm0 = vcmask 261120   ;;  %v286_v5 = vmov 32.0   ;;  %vm95_vm6 = vcmask 257024   ;;  %v287_v55 = vmov 1.4142135   ;;  %s360_s0 = inlined_call_operand.vmem [shape: bf16[16,32], index: 0, kind: input, shape index: {}]   ;;  %s361_s3 = inlined_call_operand.vmem [shape: f32[1,32], index: 3, kind: input, shape index: {}]   ;;  %s362_s4 = inlined_call_operand.vmem [shape: f32[1,32], index: 4, kind: input, shape index: {}]   ;;  %s363_s2 = inlined_call_operand.vmem [shape: f32[1,64], index: 2, kind: input, shape index: {}]   ;;  %s364_s1 = inlined_call_operand.vmem [shape: bf16[32,64], index: 1, kind: input, shape index: {}]   ;;  %s365_s5 = inlined_call_operand.vmem [shape: bf16[16,64], index: 5, kind: output, shape index: {}]  }
   0x1   :  { %v266_v0 = vld [vmem:[%s360_s0] sm:$0xff]   ;;  %274 = vrcp.f32 %v286_v5  ;;  %v264_v25 = vld [vmem:[%s364_s1 + $0x8] sm:$0xff] }
   0x2   :  { %v267_v1 = vunpack.c.l.bf16 %v266_v0  ;;  %v268_v3 = vunpack.c.h.bf16 %v266_v0  ;;  %135 = vmatpush.bf16.msra.mxu0 %v264_v25  ;;  %v263_v28 = vld [vmem:[%s364_s1] sm:$0xff] }
   0x3   :  { %v271_v38 = vld [vmem:[%s361_s3] ss:$0 sm:$0xff] }
   0x4   :  { %v30_v2 = vsel %vm29_vm0, %v267_v1, 0.0  ;;  %v33_v4 = vsel %vm29_vm0, %v268_v3, 0.0  ;;  %v272_v41 = vld [vmem:[%s362_s4] ss:$0 sm:$0xff] }
   0x5   :  { %31 = vadd.xlane.f32.xlu0 %v30_v2  ;;  %v273_v61 = vld [vmem:[%s363_s2] ss:$0 sm:$0xff] }
   0x6   :  { %136 = vmatpush.bf16.msra.mxu0 %v263_v28 }
   0x7   :  { %v275_v6 = vpop.eup %274 }
   0x8   :  { %v37_v7 = vmul.f32 32.0, %v275_v6  ;;  %vm41_vm1 = vweird.f32 %v275_v6 }
   0xa   :  { %v38_v8 = vsub.f32 1.0, %v37_v7 }
   0xc   :  { %v39_v9 = vmul.f32 %v275_v6, %v38_v8 }
   0xd   :  { %34 = vadd.xlane.f32.xlu0 %v33_v4 }
   0xe   :  { %v40_v10 = vadd.f32 %v275_v6, %v39_v9 }
  0x10   :  { %v42_v11 = vsel %vm41_vm1, %v275_v6, %v40_v10  ;;  %vm240_vm1 = vcmask 519168  }
  0x78   :  { %v32_v12 = vpop.xlane.xlu0 %31 }
  0x79   :  { %v43_v13 = vmul.f32 %v42_v11, %v32_v12 }
  0x7b   :  { %v45_v14 = vsub.f32 %v267_v1, %v43_v13 }
  0x7d   :  { %v47_v15 = vmul.f32 %v45_v14, %v45_v14 }
  0x7f   :  { %v49_v16 = vsel %vm29_vm0, %v47_v15, 0.0 }
  0x80   :  { %50 = vadd.xlane.f32.xlu1 %v49_v16  ;;  %v35_v17 = vpop.xlane.xlu0 %34 }
  0x81   :  { %v44_v18 = vmul.f32 %v42_v11, %v35_v17 }
  0x83   :  { %v46_v19 = vsub.f32 %v268_v3, %v44_v18 }
  0x85   :  { %v48_v20 = vmul.f32 %v46_v19, %v46_v19 }
  0x87   :  { %v52_v21 = vsel %vm29_vm0, %v48_v20, 0.0 }
  0x88   :  { %53 = vadd.xlane.f32.xlu1 %v52_v21 }
  0xf3   :  { %v51_v22 = vpop.xlane.xlu1 %50 }
  0xf4   :  { %v55_v23 = vmul.f32 %v51_v22, %v42_v11 }
  0xf6   :  { %v57_v24 = vadd.f32 1e-12, %v55_v23 }
  0xf8   :  { %276 = vrsqrt.f32 %v57_v24  ;;  %vm65_vm3 = vweird.f32 %v57_v24 }
  0xfb   :  { %v54_v26 = vpop.xlane.xlu1 %53 }
  0xfc   :  { %v56_v27 = vmul.f32 %v54_v26, %v42_v11 }
  0xfe   :  { %v277_v29 = vpop.eup %276  ;;  %v58_v30 = vadd.f32 1e-12, %v56_v27 }
  0xff   :  { %v60_v31 = vmul.f32 %v277_v29, %v57_v24  ;;  %vm66_vm2 = vweird.f32 %v277_v29 }
 0x100   :  { %278 = vrsqrt.f32 %v58_v30  ;;  %vm67_vm4 = vmor %vm65_vm3, %vm66_vm2  ;;  %vm75_vm7 = vweird.f32 %v58_v30 }
 0x101   :  { %v61_v32 = vmul.f32 %v277_v29, %v60_v31  ;;  %280 = vrcp.f32 %v287_v55 }
 0x103   :  { %v62_v33 = vmul.f32 0.5, %v61_v32 }
 0x105   :  { %v63_v34 = vsub.f32 1.5, %v62_v33 }
 0x106   :  { %v279_v35 = vpop.eup %278 }
 0x107   :  { %v64_v36 = vmul.f32 %v277_v29, %v63_v34  ;;  %v70_v37 = vmul.f32 %v279_v35, %v58_v30  ;;  %vm76_vm5 = vweird.f32 %v279_v35  ;;  %v281_v56 = vpop.eup %280 }
 0x108   :  { %vm77_vm8 = vmor %vm75_vm7, %vm76_vm5  ;;  %v146_v57 = vmul.f32 1.4142135, %v281_v56  ;;  %vm150_vm9 = vweird.f32 %v281_v56 }
 0x109   :  { %v68_v39 = vsel %vm67_vm4, %v277_v29, %v64_v36  ;;  %v71_v40 = vmul.f32 %v279_v35, %v70_v37 }
 0x10a   :  { %v79_v42 = vmul.f32 %v68_v39, %v45_v14  ;;  %v147_v58 = vsub.f32 1.0, %v146_v57 }
 0x10b   :  { %v72_v43 = vmul.f32 0.5, %v71_v40 }
 0x10c   :  { %v85_v44 = vmul.f32 %v271_v38, %v79_v42  ;;  %v148_v59 = vmul.f32 %v281_v56, %v147_v58 }
 0x10d   :  { %v73_v45 = vsub.f32 1.5, %v72_v43 }
 0x10e   :  { %v91_v46 = vadd.f32 %v272_v41, %v85_v44  ;;  %v149_v60 = vadd.f32 %v281_v56, %v148_v59 }
 0x10f   :  { %v74_v47 = vmul.f32 %v279_v35, %v73_v45 }
 0x110   :  { %v93_v48 = vpack.c.bf16 %v91_v46, %v91_v46  ;;  %v151_v63 = vsel %vm150_vm9, %v281_v56, %v149_v60 }
 0x111   :  { %v78_v49 = vsel %vm77_vm8, %v279_v35, %v74_v47 }
 0x112   :  { %96 = vst.msk [vmem:[#allocation2] sm:$0xf] %vm95_vm6, %v93_v48  ;;  %v80_v50 = vmul.f32 %v78_v49, %v46_v19 }
 0x114   :  { %v86_v51 = vmul.f32 %v271_v38, %v80_v50 }
 0x116   :  { %v92_v52 = vadd.f32 %v272_v41, %v86_v51 }
 0x118   :  { %v94_v53 = vpack.c.bf16 %v92_v52, %v92_v52 }
 0x11a   :  { %97 = vst.msk [vmem:[#allocation2 + $0x4] sm:$0xf] %vm95_vm6, %v94_v53 }
 0x121   :  { %v262_v54 = vld [vmem:[#allocation2] sm:$0xff] }
 0x122   :  { %259 = vmatmul.msk.bf16.vlgmr.msra.gmra.mxu0 %vm29_vm0, %v262_v54 }
 0x19f   :  { %v138_v62 = vpop.f32.mrf.mxu0 }
 0x1a0   :  { %v341_v0 = vadd.f32 %v273_v61, %v138_v62 }
 0x1a2   :  { %v152_v1 = vmul.f32 %v151_v63, %v341_v0 }
 0x1a4   :  { %v154_v2 = vmul.f32 %v152_v1, %v152_v1 }
 0x1a6   :  { %v155_v3 = vmin.f32 %v154_v2, 16.0 }
 0x1a7   :  { %v140_v4 = vpop.f32.mrf.mxu0 }
 0x1a8   :  { %v156_v5 = vmul.f32 2.1237322e-06, %v155_v3  ;;  %v167_v6 = vmul.f32 3.8918573e-05, %v155_v3  ;;  %v344_v7 = vadd.f32 %v273_v61, %v140_v4 }
 0x1aa   :  { %v157_v8 = vadd.f32 0.00028619796, %v156_v5  ;;  %v168_v9 = vadd.f32 0.001143296, %v167_v6  ;;  %v347_v10 = vmul.f32 %v151_v63, %v344_v7  ;;  %v143_v6 = vmul.f32 0.5, %v341_v0 }
 0x1ab   :  { %v144_v0 = vmul.f32 0.5, %v344_v7 }
 0x1ac   :  { %v158_v11 = vmul.f32 %v157_v8, %v155_v3  ;;  %v169_v12 = vmul.f32 %v168_v9, %v155_v3  ;;  %v194_v13 = vmul.f32 %v347_v10, %v347_v10 }
 0x1ae   :  { %v170_v14 = vadd.f32 0.014752088, %v169_v12  ;;  %v195_v15 = vmin.f32 %v194_v13, 16.0  ;;  %v159_v16 = vadd.f32 0.0036580483, %v158_v11 }
 0x1b0   :  { %v171_v17 = vmul.f32 %v170_v14, %v155_v3  ;;  %v196_v18 = vmul.f32 2.1237322e-06, %v195_v15  ;;  %v207_v19 = vmul.f32 3.8918573e-05, %v195_v15  ;;  %v160_v22 = vmul.f32 %v159_v16, %v155_v3 }
 0x1b2   :  { %v172_v20 = vadd.f32 0.112945676, %v171_v17  ;;  %v197_v21 = vadd.f32 0.00028619796, %v196_v18  ;;  %v208_v23 = vadd.f32 0.001143296, %v207_v19 }
 0x1b3   :  { %v161_v28 = vadd.f32 0.05243302, %v160_v22 }
 0x1b4   :  { %v173_v24 = vmul.f32 %v172_v20, %v155_v3  ;;  %v198_v25 = vmul.f32 %v197_v21, %v195_v15  ;;  %v209_v26 = vmul.f32 %v208_v23, %v195_v15 }
 0x1b5   :  { %v162_v34 = vmul.f32 %v161_v28, %v155_v3 }
 0x1b6   :  { %v174_v27 = vadd.f32 0.4994258, %v173_v24  ;;  %v210_v29 = vadd.f32 0.014752088, %v209_v26  ;;  %v199_v31 = vadd.f32 0.0036580483, %v198_v25 }
 0x1b7   :  { %v163_v38 = vadd.f32 0.18741608, %v162_v34 }
 0x1b8   :  { %v175_v30 = vmul.f32 %v174_v27, %v155_v3  ;;  %v211_v32 = vmul.f32 %v210_v29, %v195_v15  ;;  %v200_v36 = vmul.f32 %v199_v31, %v195_v15 }
 0x1b9   :  { %v164_v43 = vmul.f32 %v163_v38, %v155_v3 }
 0x1ba   :  { %v176_v33 = vadd.f32 1.0, %v175_v30  ;;  %v212_v35 = vadd.f32 0.112945676, %v211_v32  ;;  %v201_v40 = vadd.f32 0.05243302, %v200_v36 }
 0x1bb   :  { %v165_v49 = vadd.f32 1.1283791, %v164_v43 }
 0x1bc   :  { %282 = vrcp.f32 %v176_v33  ;;  %v213_v37 = vmul.f32 %v212_v35, %v195_v15  ;;  %v202_v46 = vmul.f32 %v201_v40, %v195_v15  ;;  %v188_v48 = vand.u32 2147483648, %v176_v33 }
 0x1bd   :  { %v186_v51 = vand.u32 2147483647, %v176_v33  ;;  %vm182_vm11 = vweird.f32 %v176_v33  ;;  %v166_v56 = vmul.f32 %v165_v49, %v152_v1 }
 0x1be   :  { %v214_v39 = vadd.f32 0.4994258, %v213_v37  ;;  %v203_v52 = vadd.f32 0.18741608, %v202_v46  ;;  %v189_v54 = vor.u32 1.1754944e-38, %v188_v48 }
 0x1bf   :  { %vm187_vm13 = vcmp.eq.f32.partialorder %v186_v51, 8.507059e+37 }
 0x1c0   :  { %v215_v41 = vmul.f32 %v214_v39, %v195_v15  ;;  %v204_v59 = vmul.f32 %v203_v52, %v195_v15 }
 0x1c2   :  { %v283_v42 = vpop.eup %282  ;;  %v216_v45 = vadd.f32 1.0, %v215_v41  ;;  %v205_v3 = vadd.f32 1.1283791, %v204_v59 }
 0x1c3   :  { %v178_v44 = vmul.f32 %v283_v42, %v176_v33  ;;  %vm183_vm10 = vweird.f32 %v283_v42 }
 0x1c4   :  { %284 = vrcp.f32 %v216_v45  ;;  %vm184_vm12 = vmor %vm182_vm11, %vm183_vm10  ;;  %v228_v2 = vand.u32 2147483648, %v216_v45  ;;  %v226_v5 = vand.u32 2147483647, %v216_v45  ;;  %vm222_vm15 = vweird.f32 %v216_v45 }
 0x1c5   :  { %v179_v47 = vsub.f32 1.0, %v178_v44  ;;  %v206_v12 = vmul.f32 %v205_v3, %v347_v10 }
 0x1c6   :  { %v229_v1 = vor.u32 1.1754944e-38, %v228_v2  ;;  %vm227_vm2 = vcmp.eq.f32.partialorder %v226_v5, 8.507059e+37 }
 0x1c7   :  { %v180_v50 = vmul.f32 %v283_v42, %v179_v47 }
 0x1c9   :  { %v181_v53 = vadd.f32 %v283_v42, %v180_v50 }
 0x1ca   :  { %v285_v55 = vpop.eup %284 }
 0x1cb   :  { %v185_v57 = vsel %vm184_vm12, %v283_v42, %v181_v53  ;;  %v218_v60 = vmul.f32 %v285_v55, %v216_v45  ;;  %vm223_vm14 = vweird.f32 %v285_v55 }
 0x1cc   :  { %v190_v58 = vsel %vm187_vm13, %v189_v54, %v185_v57  ;;  %vm224_vm0 = vmor %vm222_vm15, %vm223_vm14 }
 0x1cd   :  { %v191_v61 = vmul.f32 %v190_v58, %v166_v56  ;;  %v219_v62 = vsub.f32 1.0, %v218_v60 }
 0x1cf   :  { %v260_v63 = vclamps-f32 %v191_v61, 1.0  ;;  %v220_v4 = vmul.f32 %v285_v55, %v219_v62 }
 0x1d1   :  { %v234_v8 = vadd.f32 1.0, %v260_v63  ;;  %v221_v9 = vadd.f32 %v285_v55, %v220_v4 }
 0x1d3   :  { %v236_v11 = vmul.f32 %v234_v8, %v143_v6  ;;  %v225_v13 = vsel %vm224_vm0, %v285_v55, %v221_v9 }
 0x1d4   :  { %v230_v15 = vsel %vm227_vm2, %v229_v1, %v225_v13 }
 0x1d5   :  { %v238_v14 = vpack.c.bf16 %v236_v11, %v236_v11  ;;  %v231_v16 = vmul.f32 %v230_v15, %v206_v12 }
 0x1d7   :  { %241 = vst.msk [vmem:[%s365_s5] sm:$0xf] %vm240_vm1, %v238_v14  ;;  %v261_v17 = vclamps-f32 %v231_v16, 1.0 }
 0x1d9   :  { %v235_v18 = vadd.f32 1.0, %v261_v17 }
 0x1db   :  { %v237_v19 = vmul.f32 %v235_v18, %v144_v0 }
 0x1dd   :  { %v239_v20 = vpack.c.bf16 %v237_v19, %v237_v19 }
 0x1df   :  { %242 = vst.msk [vmem:[%s365_s5 + $0x4] sm:$0xf] %vm240_vm1, %v239_v20 }

// kernel: _lambda_.14
= control target key start
LH: loop header
LB: loop body
LE: loop exit
PB: predicated region body
PF: predicated region fallthrough
CT: control target
= control target key end

     0   :  { %s775_s15 = smov 0   ;;  %s777_s16 = smov 0   ;;  %s852_s0 = inlined_call_operand.vmem [shape: bf16[2,4,8,8], index: 0, kind: input, shape index: {}]   ;;  %s853_s1 = inlined_call_operand.vmem [shape: bf16[2,4,8,8], index: 1, kind: input, shape index: {}]   ;;  %s854_s2 = inlined_call_operand.vmem [shape: bf16[2,4,8,8], index: 2, kind: input, shape index: {}]   ;;  %s855_s3 = inlined_call_operand.vmem [shape: f32[2,1,8], index: 3, kind: input, shape index: {}]   ;;  %s856_s4 = inlined_call_operand.vmem [shape: bf16[2,4,8,8], index: 4, kind: output, shape index: {}]  }
   0x1   :  { %s779_s17 = smov 0   ;;  %s781_s18 = smov 0  }
   0x2   :  { %s783_s19 = smov 0  }
   0x3 LB: > { %s36_s20 = sadd.s32 1, %s737_s17  ;;  %s40_s21 = sadd.s32 1, %s741_s18  ;;  %s745_s19 = sphi %s783_s19, %s14_s19   ;;  %s741_s18 = sphi %s781_s18, %s860_s18   ;;  %s737_s17 = sphi %s779_s17, %s859_s17   ;;  %s733_s16 = sphi %s777_s16, %s858_s16   ;;  %s729_s15 = sphi %s775_s15, %s857_s15  }
   0x4   : > { %p38_p0 = scmp.ge.s32.totalorder %s36_s20, 4  ;;  %p641_p1 = scmp.ge.s32.totalorder %s745_s19, 1 }
   0x5   : > { %p255_p2 = scmp.lt.s32.totalorder %s745_s19, 9 }
   0x6   : > { %s862_s20 = smov (%p38_p0, %s36_s20), 0  ;;  %s864_s21 = smov (!%p38_p0, %s40_s21), %s741_s18 }
   0x7   : > { %p256_p3 = pnand %p641_p1, %p255_p2  ;;  %p42_p4 = scmp.ge.s32.totalorder %s864_s21, 2 }
   0x8   : > { %p321_p5 = scmp.lt.s32.totalorder (!%p256_p3), %s733_s16, 1  ;;  %p323_p6 = scmp.lt.s32.totalorder (!%p256_p3), %s729_s15, 3 }
   0x9   : > { %s866_s21 = smov (%p42_p4, %s864_s21), 0  ;;  %259 = sbr.rel (%p256_p3) target bundleno = 631 (0x277), region = 36 }
   0xe   : > { %s868_s16 = smov (!%p321_p5, %s733_s16), 1  ;;  %s870_s15 = smov (!%p323_p6, %s729_s15), 3  ;;  %vm379_vm0 = vcmask 64512   ;;  %vm376_vm1 = vcmask 7168   ;;  %v747_v3 = vmov -inf   ;;  %v748_v9 = vmov 0  }
   0xf   : > { %s642_s22 = sshll.u32 %s868_s16, 2  ;;  %s359_s25 = scalar_lea.vmem %s855_s3, %s868_s16  ;;  %377 = vst.msk [vmem:[#allocation2] sm:$0xff] %vm376_vm1, %v747_v3  ;;  %697 = vset.pattern.permute.xlu0 %v748_v9  ;;  %698 = vset.pattern.permute.xlu1 %v748_v9  ;;  %v749_v10 = vmov 0.0   ;;  %vm443_vm2 = vcmask 1043456   ;;  %vm476_vm3 = vcmask 60416  }
  0x10   : > { %s329_s26 = sadd.s32 %s642_s22, %s870_s15  ;;  %v700_v4 = vld [vmem:[%s359_s25] ss:$0 sm:$0xff]  ;;  %699 = vset.pattern.permute.xlu2 %v748_v9  ;;  %378 = vst.msk [vmem:[#allocation3] sm:$0xff] %vm376_vm1, %v749_v10 }
  0x11   : > { %s808_s27 = sshll.u32 %s329_s26, 2  ;;  %380 = vst.msk [vmem:[#allocation4] sm:$0xff] %vm379_vm0, %v749_v10 }
  0x12   : > { %s342_s30 = scalar_lea.vmem %s853_s1, %s808_s27  ;;  %s331_s7 = scalar_lea.vmem %s852_s0, %s808_s27 }
  0x13   : > { %v382_v0 = vld [vmem:[%s342_s30] sm:$0xf]  ;;  %s353_s10 = scalar_lea.vmem %s854_s2, %s808_s27  ;;  %s370_s13 = scalar_lea.vmem %s856_s4, %s808_s27 }
  0x14   : > { %v392_v1 = vsel %vm379_vm0, %v382_v0, 0  ;;  %v381_v2 = vld [vmem:[%s331_s7] sm:$0xf] }
  0x15   : > { %401 = vmatpush.bf16.xpose.msra.mxu0 %v392_v1  ;;  %v439_v15 = vld [vmem:[%s353_s10] sm:$0xf] }
  0x16   : > { %v407_v11 = vld [vmem:[#allocation2] sm:$0xff]  ;;  %v445_v16 = vsel %vm443_vm2, %v439_v15, 0 }
  0x17   : > { %454 = vmatpush.bf16.msra.mxu1 %v445_v16  ;;  %v423_v25 = vld [vmem:[#allocation3] sm:$0xff] }
  0x18   : > { %v431_v33 = vld [vmem:[#allocation4] sm:$0xff] }
  0x1c   : > { %650 = vmatmul.msk.bf16.vlgmr.msra.gmra.mxu0 %vm379_vm0, %v381_v2 }
  0x99   : > { %v403_v5 = vpop.f32.mrf.mxu0 }
  0x9a   : > { %v404_v6 = vadd.f32 %v700_v4, %v403_v5 }
  0x9c   : > { %v408_v7 = vsel %vm379_vm0, %v404_v6, -inf }
  0x9d   : > { %409 = vmax.xlane.f32.xlu0 %v408_v7 }
  0xa1   : > { %v405_v8 = vpop.f32.mrf.mxu0 }
 0x110   : > { %v410_v12 = vpop.xlane.xlu0 %409 }
 0x111   : > { %v411_v13 = vmax.f32 %v407_v11, %v410_v12 }
 0x113   : > { %v412_v14 = vsub.f32 %v407_v11, %v411_v13  ;;  %462 = vst.msk [vmem:[#allocation2] sm:$0xff] %vm376_vm1, %v411_v13  ;;  %417 = vperm.xlu0 %697, %v411_v13  }
 0x115   : > { %v413_v23 = vmul.f32 1.442695, %v412_v14 }
 0x185   : > { %v418_v17 = vpop.permute.xlu0 %417 }
 0x186   : > { %v420_v18 = vsub.f32 %v404_v6, %v418_v17 }
 0x188   : > { %v421_v19 = vmul.f32 1.442695, %v420_v18 }
 0x18a   : > { %701 = vpow2.f32 %v421_v19 }
 0x18b   : > { %703 = vpow2.f32 %v413_v23 }
 0x190   : > { %v702_v20 = vpop.eup %701 }
 0x191   : > { %v425_v21 = vsel %vm379_vm0, %v702_v20, 0.0  ;;  %v438_v22 = vpack.c.bf16 %v702_v20, %v702_v20  ;;  %v704_v24 = vpop.eup %703 }
 0x192   : > { %426 = vadd.xlane.f32.xlu1 %v425_v21  ;;  %v424_v26 = vmul.f32 %v704_v24, %v423_v25 }
 0x193   : > { %651 = vmatmul.msk.bf16.vlgmr.msra.gmra.mxu1 %vm379_vm0, %v438_v22 }
 0x1ab   : > { %434 = vperm.xlu1 %698, %v704_v24  }
 0x205   : > { %v427_v27 = vpop.xlane.xlu1 %426 }
 0x206   : > { %v428_v28 = vadd.f32 %v427_v27, %v424_v26 }
 0x208   : > { %430 = vst.msk [vmem:[#allocation3] sm:$0xff] %vm376_vm1, %v428_v28 }
 0x20f   : > { %v466_v29 = vld [vmem:[#allocation3] sm:$0xff] }
 0x210   : > { %v456_v30 = vpop.f32.mrf.mxu1  ;;  %705 = vrcp.f32 %v466_v29 }
 0x216   : > { %v706_v31 = vpop.eup %705 }
 0x217   : > { %471 = vperm.xlu2 %699, %v706_v31  }
 0x218   : > { %v458_v32 = vpop.f32.mrf.mxu1 }
 0x21d   : > { %v435_v34 = vpop.permute.xlu1 %434 }
 0x21e   : > { %v437_v35 = vmul.f32 %v435_v34, %v431_v33 }
 0x220   : > { %v460_v36 = vadd.f32 %v456_v30, %v437_v35 }
 0x222   : > { %461 = vst.msk [vmem:[#allocation4] sm:$0xff] %vm379_vm0, %v460_v36 }
 0x229   : > { %v468_v37 = vld [vmem:[#allocation4] sm:$0xff] }
 0x271   : > { %v472_v38 = vpop.permute.xlu2 %471 }
 0x272   : > { %v474_v39 = vmul.f32 %v472_v38, %v468_v37 }
 0x274   : > { %v475_v40 = vpack.c.bf16 %v474_v39, %v474_v39 }
 0x276   : > { %477 = vst.msk [vmem:[%s370_s13] sm:$0xf] %vm476_vm3, %v475_v40 }
 0x277 PF: > { %s14_s19 = sadd.s32 1, %s745_s19   ;;  %s857_s15 = smov %s737_s17 }
 0x278   : > { %p11_p7 = scmp.ge.s32.totalorder %s14_s19, 10   ;;  %s858_s16 = smov %s741_s18 }
 0x279   : > { %s859_s17 = smov %s862_s20  ;;  %s860_s18 = smov %s866_s21 }
 0x27a   :  { %13 = sbr.rel (!%p11_p7) target bundleno = 3 (0x3), region = 83 }

// kernel: _lambda_.15
= control target key start
LH: loop header
LB: loop body
LE: loop exit
PB: predicated region body
PF: predicated region fallthrough
CT: control target
= control target key end

     0   :  { %vm22_vm0 = vcmask 261120   ;;  %v120_v1 = vmov 0.0   ;;  %vm91_vm1 = vcmask 257024   ;;  %s172_s1 = inlined_call_operand.vmem [shape: bf16[32,32], index: 1, kind: input, shape index: {}]   ;;  %s173_s2 = inlined_call_operand.vmem [shape: f32[1,32], index: 2, kind: input, shape index: {}]   ;;  %s174_s0 = inlined_call_operand.vmem [shape: bf16[16,32], index: 0, kind: input, shape index: {}]   ;;  %s175_s3 = inlined_call_operand.vmem [shape: bf16[16,32], index: 3, kind: input, shape index: {}]   ;;  %s176_s4 = inlined_call_operand.vmem [shape: bf16[16,32], index: 4, kind: output, shape index: {}]  }
   0x1   :  { %v113_v0 = vld [vmem:[%s172_s1 + $0x8] sm:$0xff]  ;;  %23 = vst.msk [vmem:[#allocation2] sm:$0xff] %vm22_vm0, %v120_v1  ;;  %v112_v2 = vld [vmem:[%s172_s1] sm:$0xff] }
   0x2   :  { %24 = vst.msk [vmem:[#allocation2 + $0x8] sm:$0xff] %vm22_vm0, %v120_v1  ;;  %60 = vmatpush.bf16.msra.mxu0 %v113_v0  ;;  %v111_v3 = vld [vmem:[%s174_s0] sm:$0xff] }
   0x3   :  { %v115_v7 = vld [vmem:[%s175_s3] sm:$0xff]  }
   0x4   :  { %v119_v9 = vld [vmem:[%s173_s2] ss:$0 sm:$0xff]  ;;  %v116_v11 = vunpack.c.l.bf16 %v115_v7  ;;  %v117_v17 = vunpack.c.h.bf16 %v115_v7 }
   0x6   :  { %61 = vmatpush.bf16.msra.mxu0 %v112_v2 }
   0x8   :  { %v25_v4 = vld [vmem:[#allocation2] sm:$0xff] }
   0x9   :  { %110 = vmatmul.msk.bf16.vlgmr.msra.gmra.mxu0 %vm22_vm0, %v111_v3  ;;  %v26_v8 = vld [vmem:[#allocation2 + $0x8] sm:$0xff] }
  0x86   :  { %v63_v5 = vpop.f32.mrf.mxu0 }
  0x87   :  { %v68_v6 = vadd.f32 %v63_v5, %v25_v4 }
  0x89   :  { %70 = vst.msk [vmem:[#allocation2] sm:$0xff] %vm22_vm0, %v68_v6 }
  0x8e   :  { %v65_v10 = vpop.f32.mrf.mxu0 }
  0x8f   :  { %v69_v12 = vadd.f32 %v65_v10, %v26_v8 }
  0x90   :  { %v75_v13 = vld [vmem:[#allocation2] sm:$0xff] }
  0x91   :  { %v81_v14 = vadd.f32 %v119_v9, %v75_v13  ;;  %71 = vst.msk [vmem:[#allocation2 + $0x8] sm:$0xff] %vm22_vm0, %v69_v12 }
  0x93   :  { %v87_v15 = vadd.f32 %v116_v11, %v81_v14 }
  0x95   :  { %v89_v16 = vpack.c.bf16 %v87_v15, %v87_v15 }
  0x97   :  { %92 = vst.msk [vmem:[%s176_s4] sm:$0xf] %vm91_vm1, %v89_v16 }
  0x98   :  { %v76_v18 = vld [vmem:[#allocation2 + $0x8] sm:$0xff] }
  0x99   :  { %v82_v19 = vadd.f32 %v119_v9, %v76_v18 }
  0x9b   :  { %v88_v20 = vadd.f32 %v117_v17, %v82_v19 }
  0x9d   :  { %v90_v21 = vpack.c.bf16 %v88_v20, %v88_v20 }
  0x9f   :  { %93 = vst.msk [vmem:[%s176_s4 + $0x4] sm:$0xf] %vm91_vm1, %v90_v21 }

// kernel: _lambda_.17
= control target key start
LH: loop header
LB: loop body
LE: loop exit
PB: predicated region body
PF: predicated region fallthrough
CT: control target
= control target key end

     0   :  { %vm22_vm0 = vcmask 261120   ;;  %v147_v1 = vmov 0.0   ;;  %vm66_vm1 = vcmask 523264   ;;  %vm108_vm2 = vcmask 257024   ;;  %s204_s1 = inlined_call_operand.vmem [shape: bf16[64,32], index: 1, kind: input, shape index: {}]   ;;  %s205_s2 = inlined_call_operand.vmem [shape: f32[1,32], index: 2, kind: input, shape index: {}]   ;;  %s206_s0 = inlined_call_operand.vmem [shape: bf16[16,64], index: 0, kind: input, shape index: {}]   ;;  %s207_s3 = inlined_call_operand.vmem [shape: bf16[16,32], index: 3, kind: input, shape index: {}]   ;;  %s208_s4 = inlined_call_operand.vmem [shape: bf16[16,32], index: 4, kind: output, shape index: {}]  }
   0x1   :  { %v140_v0 = vld [vmem:[%s204_s1 + $0x18] sm:$0xff]  ;;  %23 = vst.msk [vmem:[#allocation2] sm:$0xff] %vm22_vm0, %v147_v1  ;;  %v139_v2 = vld [vmem:[%s204_s1 + $0x10] sm:$0xff]  ;;  %v138_v3 = vld [vmem:[%s204_s1 + $0x8] sm:$0xff] }
   0x2   :  { %24 = vst.msk [vmem:[#allocation2 + $0x8] sm:$0xff] %vm22_vm0, %v147_v1  ;;  %74 = vmatpush.bf16.msra.mxu0 %v140_v0  ;;  %v137_v4 = vld [vmem:[%s204_s1] sm:$0xff] }
   0x3   :  { %v136_v5 = vld [vmem:[%s206_s0] sm:$0xff] }
   0x4   :  { %v142_v9 = vld [vmem:[%s207_s3] sm:$0xff]  }
   0x5   :  { %v146_v11 = vld [vmem:[%s205_s2] ss:$0 sm:$0xff]  ;;  %v143_v13 = vunpack.c.l.bf16 %v142_v9  ;;  %v144_v19 = vunpack.c.h.bf16 %v142_v9 }
   0x6   :  { %75 = vmatpush.bf16.msra.mxu0 %v139_v2 }
   0x8   :  { %v25_v6 = vld [vmem:[#allocation2] sm:$0xff] }
   0x9   :  { %v26_v10 = vld [vmem:[#allocation2 + $0x8] sm:$0xff] }
   0xa   :  { %76 = vmatpush.bf16.msra.mxu0 %v138_v3 }
   0xe   :  { %77 = vmatpush.bf16.msra.mxu0 %v137_v4 }
  0x11   :  { %135 = vmatmul.msk.bf16.vlgmr.msra.gmra.mxu0 %vm66_vm1, %v136_v5 }
  0x8e   :  { %v79_v7 = vpop.f32.mrf.mxu0 }
  0x8f   :  { %v84_v8 = vadd.f32 %v79_v7, %v25_v6 }
  0x91   :  { %87 = vst.msk [vmem:[#allocation2] sm:$0xff] %vm22_vm0, %v84_v8 }
  0x96   :  { %v81_v12 = vpop.f32.mrf.mxu0 }
  0x97   :  { %v85_v14 = vadd.f32 %v81_v12, %v26_v10 }
  0x98   :  { %v92_v15 = vld [vmem:[#allocation2] sm:$0xff] }
  0x99   :  { %v98_v16 = vadd.f32 %v146_v11, %v92_v15  ;;  %88 = vst.msk [vmem:[#allocation2 + $0x8] sm:$0xff] %vm22_vm0, %v85_v14 }
  0x9b   :  { %v104_v17 = vadd.f32 %v143_v13, %v98_v16 }
  0x9d   :  { %v106_v18 = vpack.c.bf16 %v104_v17, %v104_v17 }
  0x9f   :  { %109 = vst.msk [vmem:[%s208_s4] sm:$0xf] %vm108_vm2, %v106_v18 }
  0xa0   :  { %v93_v20 = vld [vmem:[#allocation2 + $0x8] sm:$0xff] }
  0xa1   :  { %v99_v21 = vadd.f32 %v146_v11, %v93_v20 }
  0xa3   :  { %v105_v22 = vadd.f32 %v144_v19, %v99_v21 }
  0xa5   :  { %v107_v23 = vpack.c.bf16 %v105_v22, %v105_v22 }
  0xa7   :  { %110 = vst.msk [vmem:[%s208_s4 + $0x4] sm:$0xf] %vm108_vm2, %v107_v23 }

// kernel: _lambda_.25
= control target key start
LH: loop header
LB: loop body
LE: loop exit
PB: predicated region body
PF: predicated region fallthrough
CT: control target
= control target key end

     0   :  { %vm29_vm0 = vcmask 261120   ;;  %v179_v5 = vmov 32.0   ;;  %vm95_vm6 = vcmask 257024   ;;  %s239_s0 = inlined_call_operand.vmem [shape: bf16[16,32], index: 0, kind: input, shape index: {}]   ;;  %s240_s3 = inlined_call_operand.vmem [shape: f32[1,32], index: 3, kind: input, shape index: {}]   ;;  %s241_s4 = inlined_call_operand.vmem [shape: f32[1,32], index: 4, kind: input, shape index: {}]   ;;  %s242_s2 = inlined_call_operand.vmem [shape: f32[1,128], index: 2, kind: input, shape index: {}]   ;;  %s243_s1 = inlined_call_operand.vmem [shape: bf16[32,128], index: 1, kind: input, shape index: {}]   ;;  %s244_s5 = inlined_call_operand.vmem [shape: f32[16,128], index: 5, kind: output, shape index: {}]  }
   0x1   :  { %v166_v0 = vld [vmem:[%s239_s0] sm:$0xff]   ;;  %173 = vrcp.f32 %v179_v5  ;;  %v164_v25 = vld [vmem:[%s243_s1 + $0x8] sm:$0xff] }
   0x2   :  { %v167_v1 = vunpack.c.l.bf16 %v166_v0  ;;  %v168_v3 = vunpack.c.h.bf16 %v166_v0  ;;  %135 = vmatpush.bf16.msra.mxu0 %v164_v25  ;;  %v163_v28 = vld [vmem:[%s243_s1] sm:$0xff] }
   0x3   :  { %v170_v38 = vld [vmem:[%s240_s3] ss:$0 sm:$0xff] }
   0x4   :  { %v30_v2 = vsel %vm29_vm0, %v167_v1, 0.0  ;;  %v33_v4 = vsel %vm29_vm0, %v168_v3, 0.0  ;;  %v171_v41 = vld [vmem:[%s241_s4] ss:$0 sm:$0xff] }
   0x5   :  { %31 = vadd.xlane.f32.xlu0 %v30_v2  ;;  %v172_v55 = vld [vmem:[%s242_s2] ss:$0 sm:$0xff] }
   0x6   :  { %136 = vmatpush.bf16.msra.mxu0 %v163_v28 }
   0x7   :  { %v174_v6 = vpop.eup %173 }
   0x8   :  { %v37_v7 = vmul.f32 32.0, %v174_v6  ;;  %vm41_vm1 = vweird.f32 %v174_v6 }
   0xa   :  { %v38_v8 = vsub.f32 1.0, %v37_v7 }
   0xc   :  { %v39_v9 = vmul.f32 %v174_v6, %v38_v8 }
   0xd   :  { %34 = vadd.xlane.f32.xlu0 %v33_v4 }
   0xe   :  { %v40_v10 = vadd.f32 %v174_v6, %v39_v9 }
  0x10   :  { %v42_v11 = vsel %vm41_vm1, %v174_v6, %v40_v10 }
  0x78   :  { %v32_v12 = vpop.xlane.xlu0 %31 }
  0x79   :  { %v43_v13 = vmul.f32 %v42_v11, %v32_v12 }
  0x7b   :  { %v45_v14 = vsub.f32 %v167_v1, %v43_v13 }
  0x7d   :  { %v47_v15 = vmul.f32 %v45_v14, %v45_v14 }
  0x7f   :  { %v49_v16 = vsel %vm29_vm0, %v47_v15, 0.0 }
  0x80   :  { %50 = vadd.xlane.f32.xlu1 %v49_v16  ;;  %v35_v17 = vpop.xlane.xlu0 %34 }
  0x81   :  { %v44_v18 = vmul.f32 %v42_v11, %v35_v17 }
  0x83   :  { %v46_v19 = vsub.f32 %v168_v3, %v44_v18 }
  0x85   :  { %v48_v20 = vmul.f32 %v46_v19, %v46_v19 }
  0x87   :  { %v52_v21 = vsel %vm29_vm0, %v48_v20, 0.0 }
  0x88   :  { %53 = vadd.xlane.f32.xlu1 %v52_v21 }
  0xf3   :  { %v51_v22 = vpop.xlane.xlu1 %50 }
  0xf4   :  { %v55_v23 = vmul.f32 %v51_v22, %v42_v11 }
  0xf6   :  { %v57_v24 = vadd.f32 1e-12, %v55_v23 }
  0xf8   :  { %175 = vrsqrt.f32 %v57_v24  ;;  %vm65_vm3 = vweird.f32 %v57_v24 }
  0xfb   :  { %v54_v26 = vpop.xlane.xlu1 %53 }
  0xfc   :  { %v56_v27 = vmul.f32 %v54_v26, %v42_v11 }
  0xfe   :  { %v176_v29 = vpop.eup %175  ;;  %v58_v30 = vadd.f32 1e-12, %v56_v27 }
  0xff   :  { %v60_v31 = vmul.f32 %v176_v29, %v57_v24  ;;  %vm66_vm2 = vweird.f32 %v176_v29 }
 0x100   :  { %177 = vrsqrt.f32 %v58_v30  ;;  %vm67_vm4 = vmor %vm65_vm3, %vm66_vm2  ;;  %vm75_vm7 = vweird.f32 %v58_v30 }
 0x101   :  { %v61_v32 = vmul.f32 %v176_v29, %v60_v31 }
 0x103   :  { %v62_v33 = vmul.f32 0.5, %v61_v32 }
 0x105   :  { %v63_v34 = vsub.f32 1.5, %v62_v33 }
 0x106   :  { %v178_v35 = vpop.eup %177 }
 0x107   :  { %v64_v36 = vmul.f32 %v176_v29, %v63_v34  ;;  %v70_v37 = vmul.f32 %v178_v35, %v58_v30  ;;  %vm76_vm5 = vweird.f32 %v178_v35 }
 0x108   :  { %vm77_vm8 = vmor %vm75_vm7, %vm76_vm5 }
 0x109   :  { %v68_v39 = vsel %vm67_vm4, %v176_v29, %v64_v36  ;;  %v71_v40 = vmul.f32 %v178_v35, %v70_v37 }
 0x10a   :  { %v79_v42 = vmul.f32 %v68_v39, %v45_v14 }
 0x10b   :  { %v72_v43 = vmul.f32 0.5, %v71_v40 }
 0x10c   :  { %v85_v44 = vmul.f32 %v170_v38, %v79_v42 }
 0x10d   :  { %v73_v45 = vsub.f32 1.5, %v72_v43 }
 0x10e   :  { %v91_v46 = vadd.f32 %v171_v41, %v85_v44 }
 0x10f   :  { %v74_v47 = vmul.f32 %v178_v35, %v73_v45 }
 0x110   :  { %v93_v48 = vpack.c.bf16 %v91_v46, %v91_v46 }
 0x111   :  { %v78_v49 = vsel %vm77_vm8, %v178_v35, %v74_v47 }
 0x112   :  { %96 = vst.msk [vmem:[#allocation2] sm:$0xf] %vm95_vm6, %v93_v48  ;;  %v80_v50 = vmul.f32 %v78_v49, %v46_v19 }
 0x114   :  { %v86_v51 = vmul.f32 %v170_v38, %v80_v50 }
 0x116   :  { %v92_v52 = vadd.f32 %v171_v41, %v86_v51 }
 0x118   :  { %v94_v53 = vpack.c.bf16 %v92_v52, %v92_v52 }
 0x11a   :  { %97 = vst.msk [vmem:[#allocation2 + $0x4] sm:$0xf] %vm95_vm6, %v94_v53 }
 0x121   :  { %v162_v54 = vld [vmem:[#allocation2] sm:$0xff] }
 0x122   :  { %161 = vmatmul.msk.bf16.vlgmr.msra.gmra.mxu0 %vm29_vm0, %v162_v54 }
 0x19f   :  { %v138_v56 = vpop.f32.mrf.mxu0 }
 0x1a0   :  { %v139_v57 = vadd.f32 %v172_v55, %v138_v56 }
 0x1a2   :  { %143 = vst [vmem:[%s244_s5] sm:$0xff] %v139_v57 }
 0x1a7   :  { %v140_v58 = vpop.f32.mrf.mxu0 }
 0x1a8   :  { %v141_v59 = vadd.f32 %v172_v55, %v140_v58 }
 0x1aa   :  { %144 = vst [vmem:[%s244_s5 + $0x8] sm:$0xff] %v141_v59 }

// kernel: _lambda_.24
= control target key start
LH: loop header
LB: loop body
LE: loop exit
PB: predicated region body
PF: predicated region fallthrough
CT: control target
= control target key end

     0   :  { %vm29_vm0 = vcmask 261120   ;;  %v286_v5 = vmov 32.0   ;;  %vm95_vm6 = vcmask 257024   ;;  %v287_v55 = vmov 1.4142135   ;;  %s364_s0 = inlined_call_operand.vmem [shape: bf16[16,32], index: 0, kind: input, shape index: {}]   ;;  %s365_s3 = inlined_call_operand.vmem [shape: f32[1,32], index: 3, kind: input, shape index: {}]   ;;  %s366_s4 = inlined_call_operand.vmem [shape: f32[1,32], index: 4, kind: input, shape index: {}]   ;;  %s367_s2 = inlined_call_operand.vmem [shape: f32[1,32], index: 2, kind: input, shape index: {}]   ;;  %s368_s1 = inlined_call_operand.vmem [shape: bf16[32,32], index: 1, kind: input, shape index: {}]   ;;  %s369_s5 = inlined_call_operand.vmem [shape: bf16[16,32], index: 5, kind: output, shape index: {}]  }
   0x1   :  { %v266_v0 = vld [vmem:[%s364_s0] sm:$0xff]   ;;  %274 = vrcp.f32 %v286_v5  ;;  %v264_v25 = vld [vmem:[%s368_s1 + $0x8] sm:$0xff] }
   0x2   :  { %v267_v1 = vunpack.c.l.bf16 %v266_v0  ;;  %v268_v3 = vunpack.c.h.bf16 %v266_v0  ;;  %135 = vmatpush.bf16.msra.mxu0 %v264_v25  ;;  %v263_v28 = vld [vmem:[%s368_s1] sm:$0xff] }
   0x3   :  { %v271_v38 = vld [vmem:[%s365_s3] ss:$0 sm:$0xff] }
   0x4   :  { %v30_v2 = vsel %vm29_vm0, %v267_v1, 0.0  ;;  %v33_v4 = vsel %vm29_vm0, %v268_v3, 0.0  ;;  %v272_v41 = vld [vmem:[%s366_s4] ss:$0 sm:$0xff] }
   0x5   :  { %31 = vadd.xlane.f32.xlu0 %v30_v2  ;;  %v273_v61 = vld [vmem:[%s367_s2] ss:$0 sm:$0xff] }
   0x6   :  { %136 = vmatpush.bf16.msra.mxu0 %v263_v28 }
   0x7   :  { %v275_v6 = vpop.eup %274 }
   0x8   :  { %v37_v7 = vmul.f32 32.0, %v275_v6  ;;  %vm41_vm1 = vweird.f32 %v275_v6 }
   0xa   :  { %v38_v8 = vsub.f32 1.0, %v37_v7 }
   0xc   :  { %v39_v9 = vmul.f32 %v275_v6, %v38_v8 }
   0xd   :  { %34 = vadd.xlane.f32.xlu0 %v33_v4 }
   0xe   :  { %v40_v10 = vadd.f32 %v275_v6, %v39_v9 }
  0x10   :  { %v42_v11 = vsel %vm41_vm1, %v275_v6, %v40_v10 }
  0x78   :  { %v32_v12 = vpop.xlane.xlu0 %31 }
  0x79   :  { %v43_v13 = vmul.f32 %v42_v11, %v32_v12 }
  0x7b   :  { %v45_v14 = vsub.f32 %v267_v1, %v43_v13 }
  0x7d   :  { %v47_v15 = vmul.f32 %v45_v14, %v45_v14 }
  0x7f   :  { %v49_v16 = vsel %vm29_vm0, %v47_v15, 0.0 }
  0x80   :  { %50 = vadd.xlane.f32.xlu1 %v49_v16  ;;  %v35_v17 = vpop.xlane.xlu0 %34 }
  0x81   :  { %v44_v18 = vmul.f32 %v42_v11, %v35_v17 }
  0x83   :  { %v46_v19 = vsub.f32 %v268_v3, %v44_v18 }
  0x85   :  { %v48_v20 = vmul.f32 %v46_v19, %v46_v19 }
  0x87   :  { %v52_v21 = vsel %vm29_vm0, %v48_v20, 0.0 }
  0x88   :  { %53 = vadd.xlane.f32.xlu1 %v52_v21 }
  0xf3   :  { %v51_v22 = vpop.xlane.xlu1 %50 }
  0xf4   :  { %v55_v23 = vmul.f32 %v51_v22, %v42_v11 }
  0xf6   :  { %v57_v24 = vadd.f32 1e-12, %v55_v23 }
  0xf8   :  { %276 = vrsqrt.f32 %v57_v24  ;;  %vm65_vm3 = vweird.f32 %v57_v24 }
  0xfb   :  { %v54_v26 = vpop.xlane.xlu1 %53 }
  0xfc   :  { %v56_v27 = vmul.f32 %v54_v26, %v42_v11 }
  0xfe   :  { %v277_v29 = vpop.eup %276  ;;  %v58_v30 = vadd.f32 1e-12, %v56_v27 }
  0xff   :  { %v60_v31 = vmul.f32 %v277_v29, %v57_v24  ;;  %vm66_vm2 = vweird.f32 %v277_v29 }
 0x100   :  { %278 = vrsqrt.f32 %v58_v30  ;;  %vm67_vm4 = vmor %vm65_vm3, %vm66_vm2  ;;  %vm75_vm7 = vweird.f32 %v58_v30 }
 0x101   :  { %v61_v32 = vmul.f32 %v277_v29, %v60_v31  ;;  %280 = vrcp.f32 %v287_v55 }
 0x103   :  { %v62_v33 = vmul.f32 0.5, %v61_v32 }
 0x105   :  { %v63_v34 = vsub.f32 1.5, %v62_v33 }
 0x106   :  { %v279_v35 = vpop.eup %278 }
 0x107   :  { %v64_v36 = vmul.f32 %v277_v29, %v63_v34  ;;  %v70_v37 = vmul.f32 %v279_v35, %v58_v30  ;;  %vm76_vm5 = vweird.f32 %v279_v35  ;;  %v281_v56 = vpop.eup %280 }
 0x108   :  { %vm77_vm8 = vmor %vm75_vm7, %vm76_vm5  ;;  %v146_v57 = vmul.f32 1.4142135, %v281_v56  ;;  %vm150_vm9 = vweird.f32 %v281_v56 }
 0x109   :  { %v68_v39 = vsel %vm67_vm4, %v277_v29, %v64_v36  ;;  %v71_v40 = vmul.f32 %v279_v35, %v70_v37 }
 0x10a   :  { %v79_v42 = vmul.f32 %v68_v39, %v45_v14  ;;  %v147_v58 = vsub.f32 1.0, %v146_v57 }
 0x10b   :  { %v72_v43 = vmul.f32 0.5, %v71_v40 }
 0x10c   :  { %v85_v44 = vmul.f32 %v271_v38, %v79_v42  ;;  %v148_v59 = vmul.f32 %v281_v56, %v147_v58 }
 0x10d   :  { %v73_v45 = vsub.f32 1.5, %v72_v43 }
 0x10e   :  { %v91_v46 = vadd.f32 %v272_v41, %v85_v44  ;;  %v149_v60 = vadd.f32 %v281_v56, %v148_v59 }
 0x10f   :  { %v74_v47 = vmul.f32 %v279_v35, %v73_v45 }
 0x110   :  { %v93_v48 = vpack.c.bf16 %v91_v46, %v91_v46  ;;  %v151_v63 = vsel %vm150_vm9, %v281_v56, %v149_v60 }
 0x111   :  { %v78_v49 = vsel %vm77_vm8, %v279_v35, %v74_v47 }
 0x112   :  { %96 = vst.msk [vmem:[#allocation2] sm:$0xf] %vm95_vm6, %v93_v48  ;;  %v80_v50 = vmul.f32 %v78_v49, %v46_v19 }
 0x114   :  { %v86_v51 = vmul.f32 %v271_v38, %v80_v50 }
 0x116   :  { %v92_v52 = vadd.f32 %v272_v41, %v86_v51 }
 0x118   :  { %v94_v53 = vpack.c.bf16 %v92_v52, %v92_v52 }
 0x11a   :  { %97 = vst.msk [vmem:[#allocation2 + $0x4] sm:$0xf] %vm95_vm6, %v94_v53 }
 0x121   :  { %v262_v54 = vld [vmem:[#allocation2] sm:$0xff] }
 0x122   :  { %259 = vmatmul.msk.bf16.vlgmr.msra.gmra.mxu0 %vm29_vm0, %v262_v54 }
 0x19f   :  { %v138_v62 = vpop.f32.mrf.mxu0 }
 0x1a0   :  { %v343_v0 = vadd.f32 %v273_v61, %v138_v62 }
 0x1a2   :  { %v152_v1 = vmul.f32 %v151_v63, %v343_v0 }
 0x1a4   :  { %v154_v2 = vmul.f32 %v152_v1, %v152_v1 }
 0x1a6   :  { %v155_v3 = vmin.f32 %v154_v2, 16.0 }
 0x1a7   :  { %v140_v4 = vpop.f32.mrf.mxu0 }
 0x1a8   :  { %v156_v5 = vmul.f32 2.1237322e-06, %v155_v3  ;;  %v167_v6 = vmul.f32 3.8918573e-05, %v155_v3  ;;  %v346_v7 = vadd.f32 %v273_v61, %v140_v4 }
 0x1aa   :  { %v157_v8 = vadd.f32 0.00028619796, %v156_v5  ;;  %v168_v9 = vadd.f32 0.001143296, %v167_v6  ;;  %v349_v10 = vmul.f32 %v151_v63, %v346_v7  ;;  %v143_v6 = vmul.f32 0.5, %v343_v0 }
 0x1ab   :  { %v144_v0 = vmul.f32 0.5, %v346_v7 }
 0x1ac   :  { %v158_v11 = vmul.f32 %v157_v8, %v155_v3  ;;  %v169_v12 = vmul.f32 %v168_v9, %v155_v3  ;;  %v194_v13 = vmul.f32 %v349_v10, %v349_v10 }
 0x1ae   :  { %v170_v14 = vadd.f32 0.014752088, %v169_v12  ;;  %v195_v15 = vmin.f32 %v194_v13, 16.0  ;;  %v159_v16 = vadd.f32 0.0036580483, %v158_v11 }
 0x1b0   :  { %v171_v17 = vmul.f32 %v170_v14, %v155_v3  ;;  %v196_v18 = vmul.f32 2.1237322e-06, %v195_v15  ;;  %v207_v19 = vmul.f32 3.8918573e-05, %v195_v15  ;;  %v160_v22 = vmul.f32 %v159_v16, %v155_v3 }
 0x1b2   :  { %v172_v20 = vadd.f32 0.112945676, %v171_v17  ;;  %v197_v21 = vadd.f32 0.00028619796, %v196_v18  ;;  %v208_v23 = vadd.f32 0.001143296, %v207_v19 }
 0x1b3   :  { %v161_v28 = vadd.f32 0.05243302, %v160_v22 }
 0x1b4   :  { %v173_v24 = vmul.f32 %v172_v20, %v155_v3  ;;  %v198_v25 = vmul.f32 %v197_v21, %v195_v15  ;;  %v209_v26 = vmul.f32 %v208_v23, %v195_v15 }
 0x1b5   :  { %v162_v34 = vmul.f32 %v161_v28, %v155_v3 }
 0x1b6   :  { %v174_v27 = vadd.f32 0.4994258, %v173_v24  ;;  %v210_v29 = vadd.f32 0.014752088, %v209_v26  ;;  %v199_v31 = vadd.f32 0.0036580483, %v198_v25 }
 0x1b7   :  { %v163_v38 = vadd.f32 0.18741608, %v162_v34 }
 0x1b8   :  { %v175_v30 = vmul.f32 %v174_v27, %v155_v3  ;;  %v211_v32 = vmul.f32 %v210_v29, %v195_v15  ;;  %v200_v36 = vmul.f32 %v199_v31, %v195_v15 }
 0x1b9   :  { %v164_v43 = vmul.f32 %v163_v38, %v155_v3 }
 0x1ba   :  { %v176_v33 = vadd.f32 1.0, %v175_v30  ;;  %v212_v35 = vadd.f32 0.112945676, %v211_v32  ;;  %v201_v40 = vadd.f32 0.05243302, %v200_v36 }
 0x1bb   :  { %v165_v49 = vadd.f32 1.1283791, %v164_v43 }
 0x1bc   :  { %282 = vrcp.f32 %v176_v33  ;;  %v213_v37 = vmul.f32 %v212_v35, %v195_v15  ;;  %v202_v46 = vmul.f32 %v201_v40, %v195_v15  ;;  %v188_v48 = vand.u32 2147483648, %v176_v33 }
 0x1bd   :  { %v186_v51 = vand.u32 2147483647, %v176_v33  ;;  %vm182_vm11 = vweird.f32 %v176_v33  ;;  %v166_v56 = vmul.f32 %v165_v49, %v152_v1 }
 0x1be   :  { %v214_v39 = vadd.f32 0.4994258, %v213_v37  ;;  %v203_v52 = vadd.f32 0.18741608, %v202_v46  ;;  %v189_v54 = vor.u32 1.1754944e-38, %v188_v48 }
 0x1bf   :  { %vm187_vm13 = vcmp.eq.f32.partialorder %v186_v51, 8.507059e+37 }
 0x1c0   :  { %v215_v41 = vmul.f32 %v214_v39, %v195_v15  ;;  %v204_v59 = vmul.f32 %v203_v52, %v195_v15 }
 0x1c2   :  { %v283_v42 = vpop.eup %282  ;;  %v216_v45 = vadd.f32 1.0, %v215_v41  ;;  %v205_v3 = vadd.f32 1.1283791, %v204_v59 }
 0x1c3   :  { %v178_v44 = vmul.f32 %v283_v42, %v176_v33  ;;  %vm183_vm10 = vweird.f32 %v283_v42 }
 0x1c4   :  { %284 = vrcp.f32 %v216_v45  ;;  %vm184_vm12 = vmor %vm182_vm11, %vm183_vm10  ;;  %v228_v2 = vand.u32 2147483648, %v216_v45  ;;  %v226_v5 = vand.u32 2147483647, %v216_v45  ;;  %vm222_vm15 = vweird.f32 %v216_v45 }
 0x1c5   :  { %v179_v47 = vsub.f32 1.0, %v178_v44  ;;  %v206_v12 = vmul.f32 %v205_v3, %v349_v10 }
 0x1c6   :  { %v229_v1 = vor.u32 1.1754944e-38, %v228_v2  ;;  %vm227_vm1 = vcmp.eq.f32.partialorder %v226_v5, 8.507059e+37 }
 0x1c7   :  { %v180_v50 = vmul.f32 %v283_v42, %v179_v47 }
 0x1c9   :  { %v181_v53 = vadd.f32 %v283_v42, %v180_v50 }
 0x1ca   :  { %v285_v55 = vpop.eup %284 }
 0x1cb   :  { %v185_v57 = vsel %vm184_vm12, %v283_v42, %v181_v53  ;;  %v218_v60 = vmul.f32 %v285_v55, %v216_v45  ;;  %vm223_vm14 = vweird.f32 %v285_v55 }
 0x1cc   :  { %v190_v58 = vsel %vm187_vm13, %v189_v54, %v185_v57  ;;  %vm224_vm0 = vmor %vm222_vm15, %vm223_vm14 }
 0x1cd   :  { %v191_v61 = vmul.f32 %v190_v58, %v166_v56  ;;  %v219_v62 = vsub.f32 1.0, %v218_v60 }
 0x1cf   :  { %v260_v63 = vclamps-f32 %v191_v61, 1.0  ;;  %v220_v4 = vmul.f32 %v285_v55, %v219_v62 }
 0x1d1   :  { %v234_v8 = vadd.f32 1.0, %v260_v63  ;;  %v221_v9 = vadd.f32 %v285_v55, %v220_v4 }
 0x1d3   :  { %v236_v11 = vmul.f32 %v234_v8, %v143_v6  ;;  %v225_v13 = vsel %vm224_vm0, %v285_v55, %v221_v9 }
 0x1d4   :  { %v230_v15 = vsel %vm227_vm1, %v229_v1, %v225_v13 }
 0x1d5   :  { %v238_v14 = vpack.c.bf16 %v236_v11, %v236_v11  ;;  %v231_v16 = vmul.f32 %v230_v15, %v206_v12 }
 0x1d7   :  { %241 = vst.msk [vmem:[%s369_s5] sm:$0xf] %vm95_vm6, %v238_v14  ;;  %v261_v17 = vclamps-f32 %v231_v16, 1.0 }
 0x1d9   :  { %v235_v18 = vadd.f32 1.0, %v261_v17 }
 0x1db   :  { %v237_v19 = vmul.f32 %v235_v18, %v144_v0 }
 0x1dd   :  { %v239_v20 = vpack.c.bf16 %v237_v19, %v237_v19 }
 0x1df   :  { %242 = vst.msk [vmem:[%s369_s5 + $0x4] sm:$0xf] %vm95_vm6, %v239_v20 }

// kernel: _lambda_.23
= control target key start
LH: loop header
LB: loop body
LE: loop exit
PB: predicated region body
PF: predicated region fallthrough
CT: control target
= control target key end

     0   :  { %vm19_vm0 = vcmask 261120   ;;  %s188_s0 = inlined_call_operand.vmem [shape: bf16[16,32], index: 0, kind: input, shape index: {}]   ;;  %s189_s1 = inlined_call_operand.vmem [shape: f32[1,32], index: 1, kind: input, shape index: {}]   ;;  %s190_s2 = inlined_call_operand.vmem [shape: f32[1,32], index: 2, kind: input, shape index: {}]   ;;  %s191_s3 = inlined_call_operand.hbm [shape: bf16[16,32], index: 3, kind: output, shape index: {}]  }
   0x1   :  { %v107_v0 = vld [vmem:[%s188_s0] sm:$0xff]  }
   0x2   :  { %v108_v1 = vunpack.c.l.bf16 %v107_v0 }
   0x3   :  { %8 = vsyncpa [#allocation3], 0  ;;  %v109_v3 = vunpack.c.h.bf16 %v107_v0  ;;  %v148_v5 = vmov 32.0   ;;  %v114_v36 = vld [vmem:[%s189_s1] ss:$0 sm:$0xff]  ;;  %vm85_vm7 = vcmask 257024  }
   0x4   :  { %v20_v2 = vsel %vm19_vm0, %v108_v1, 0.0  ;;  %116 = vrcp.f32 %v148_v5  ;;  %v115_v39 = vld [vmem:[%s190_s2] ss:$0 sm:$0xff]  ;;  %s149_s1 = smov [#allocation2]   ;;  %s94_s2 = sshll.u32 %s191_s3, 4  ;;  %s95_s2 = int_to_ptr.hbm [resolvable:$true] %s94_s2 }
   0x5   :  { %21 = vadd.xlane.f32.xlu0 %v20_v2  ;;  %v23_v4 = vsel %vm19_vm0, %v109_v3, 0.0  ;;  %s92_s17 = sshll.u32 %s149_s1, 4  ;;  %s150_s20 = smov 64   ;;  %s93_s17 = int_to_ptr.vmem [resolvable:$true] %s92_s17 }
   0x6   :  { %s151_s21 = smov 4  }
   0xa   :  { %v117_v6 = vpop.eup %116 }
   0xb   :  { %v27_v7 = vmul.f32 32.0, %v117_v6  ;;  %vm31_vm1 = vweird.f32 %v117_v6 }
   0xd   :  { %24 = vadd.xlane.f32.xlu0 %v23_v4  ;;  %v28_v8 = vsub.f32 1.0, %v27_v7 }
   0xf   :  { %v29_v9 = vmul.f32 %v117_v6, %v28_v8 }
  0x11   :  { %v30_v10 = vadd.f32 %v117_v6, %v29_v9 }
  0x13   :  { %v32_v11 = vsel %vm31_vm1, %v117_v6, %v30_v10 }
  0x78   :  { %v22_v12 = vpop.xlane.xlu0 %21 }
  0x79   :  { %v33_v13 = vmul.f32 %v32_v11, %v22_v12 }
  0x7b   :  { %v35_v14 = vsub.f32 %v108_v1, %v33_v13 }
  0x7d   :  { %v37_v15 = vmul.f32 %v35_v14, %v35_v14 }
  0x7f   :  { %v39_v16 = vsel %vm19_vm0, %v37_v15, 0.0 }
  0x80   :  { %40 = vadd.xlane.f32.xlu1 %v39_v16  ;;  %v25_v17 = vpop.xlane.xlu0 %24 }
  0x81   :  { %v34_v18 = vmul.f32 %v32_v11, %v25_v17 }
  0x83   :  { %v36_v19 = vsub.f32 %v109_v3, %v34_v18 }
  0x85   :  { %v38_v20 = vmul.f32 %v36_v19, %v36_v19 }
  0x87   :  { %v42_v21 = vsel %vm19_vm0, %v38_v20, 0.0 }
  0x88   :  { %43 = vadd.xlane.f32.xlu1 %v42_v21 }
  0xf3   :  { %v41_v22 = vpop.xlane.xlu1 %40 }
  0xf4   :  { %v45_v23 = vmul.f32 %v41_v22, %v32_v11 }
  0xf6   :  { %v47_v24 = vadd.f32 1e-12, %v45_v23 }
  0xf8   :  { %118 = vrsqrt.f32 %v47_v24  ;;  %vm55_vm3 = vweird.f32 %v47_v24 }
  0xfb   :  { %v44_v25 = vpop.xlane.xlu1 %43 }
  0xfc   :  { %v46_v26 = vmul.f32 %v44_v25, %v32_v11 }
  0xfe   :  { %v119_v27 = vpop.eup %118  ;;  %v48_v28 = vadd.f32 1e-12, %v46_v26 }
  0xff   :  { %v50_v29 = vmul.f32 %v119_v27, %v47_v24  ;;  %vm56_vm2 = vweird.f32 %v119_v27 }
 0x100   :  { %120 = vrsqrt.f32 %v48_v28  ;;  %vm57_vm4 = vmor %vm55_vm3, %vm56_vm2  ;;  %vm65_vm6 = vweird.f32 %v48_v28 }
 0x101   :  { %v51_v30 = vmul.f32 %v119_v27, %v50_v29 }
 0x103   :  { %v52_v31 = vmul.f32 0.5, %v51_v30 }
 0x105   :  { %v53_v32 = vsub.f32 1.5, %v52_v31 }
 0x106   :  { %v121_v33 = vpop.eup %120 }
 0x107   :  { %v54_v34 = vmul.f32 %v119_v27, %v53_v32  ;;  %v60_v35 = vmul.f32 %v121_v33, %v48_v28  ;;  %vm66_vm5 = vweird.f32 %v121_v33 }
 0x108   :  { %vm67_vm8 = vmor %vm65_vm6, %vm66_vm5 }
 0x109   :  { %v58_v37 = vsel %vm57_vm4, %v119_v27, %v54_v34  ;;  %v61_v38 = vmul.f32 %v121_v33, %v60_v35 }
 0x10a   :  { %v69_v40 = vmul.f32 %v58_v37, %v35_v14 }
 0x10b   :  { %v62_v41 = vmul.f32 0.5, %v61_v38 }
 0x10c   :  { %v75_v42 = vmul.f32 %v114_v36, %v69_v40 }
 0x10d   :  { %v63_v43 = vsub.f32 1.5, %v62_v41 }
 0x10e   :  { %v81_v44 = vadd.f32 %v115_v39, %v75_v42 }
 0x10f   :  { %v64_v45 = vmul.f32 %v121_v33, %v63_v43 }
 0x110   :  { %v83_v46 = vpack.c.bf16 %v81_v44, %v81_v44 }
 0x111   :  { %v68_v47 = vsel %vm67_vm8, %v121_v33, %v64_v45 }
 0x112   :  { %v70_v48 = vmul.f32 %v68_v47, %v36_v19  ;;  %86 = vst.msk [vmem:[#allocation2] sm:$0xf] %vm85_vm7, %v83_v46 }
 0x114   :  { %v76_v49 = vmul.f32 %v114_v36, %v70_v48 }
 0x116   :  { %v82_v50 = vadd.f32 %v115_v39, %v76_v49 }
 0x118   :  { %v84_v51 = vpack.c.bf16 %v82_v50, %v82_v50 }
 0x11a   :  { %87 = vst.msk [vmem:[#allocation2 + $0x4] sm:$0xf] %vm85_vm7, %v84_v51 }
 0x11b   :  { %100 = dma.vmem_to_hbm [thread:$0]  %s93_s17, 128, %s95_s2, [#allocation3], %s150_s20, %s150_s20, %s151_s21  }
 0x11c   :  { %146 = dma.done.wait [#allocation3], 128  }
 0x11d   :  { %147 = vsyncadd [#allocation3], 4294967168 }
 0x11e   :  { %105 = vsyncpa [#allocation3], 1 }

</bundles_post_ra>
